<compile_context>
chip_gen: v7x
topology: tpu7x:2x2x1
jax: 0.10.0
libtpu: 0.0.40
codegen_flags: <defaults>
</compile_context>

<pallas_src>
import jax
import jax.numpy as jnp
from jax import lax
from jax.experimental import pallas as pl
from jax.experimental.pallas import tpu as pltpu

EPS = 1e-12  # torch.nn.functional.normalize default eps


def _round_up(n, m):
    return ((n + m - 1) // m) * m


def _pad2d(x, rows, cols):
    r, c = x.shape
    return jnp.pad(x, ((0, rows - r), (0, cols - c)))


def node_gcn_kernel(x_ref, a_ref, w1_ref, w2_ref, w3_ref, b_ref, wl_ref, bl_ref,
                    out_ref):
    a = a_ref[...]  # (Np, Np) bf16 normalized adjacency

    def gcn_layer(h_bf16, w_bf16, b_row_f32):
        # GCNConv: A_hat @ (H @ W) + bias   (bf16 MXU operands, f32 accumulation)
        xw = jnp.dot(h_bf16, w_bf16, preferred_element_type=jnp.float32)          # (Np, Hp)
        agg = jnp.dot(a, xw.astype(jnp.bfloat16),
                      preferred_element_type=jnp.float32) + b_row_f32             # (Np, Hp)
        # F.normalize(p=2, dim=1): clamp the sum of squares at EPS^2 and use rsqrt (EUP)
        sumsq = jnp.sum(agg * agg, axis=1, keepdims=True)
        inv = lax.rsqrt(jnp.maximum(sumsq, EPS * EPS))
        # ReLU
        return jnp.maximum(agg * inv, 0.0)

    # Layer 1 + incremental final-linear accumulation.
    o1 = gcn_layer(x_ref[...], w1_ref[...], b_ref[0:1, :]).astype(jnp.bfloat16)
    logits = jnp.dot(o1, wl_ref[0], preferred_element_type=jnp.float32)
    # Layer 2
    o2 = gcn_layer(o1, w2_ref[...], b_ref[1:2, :]).astype(jnp.bfloat16)
    logits += jnp.dot(o2, wl_ref[1], preferred_element_type=jnp.float32)
    # Layer 3
    o3 = gcn_layer(o2, w3_ref[...], b_ref[2:3, :]).astype(jnp.bfloat16)
    logits += jnp.dot(o3, wl_ref[2], preferred_element_type=jnp.float32)

    out_ref[...] = logits + bl_ref[...]


def node_gcn_forward(x, a_hat, params, hidden_size):
    """x: (N, F) f32; a_hat: (N, N) f32; params: unpadded f32 weights. Returns (N, C) f32."""
    N, F = x.shape
    H = hidden_size
    C = params["bl"].shape[-1]

    Np = _round_up(max(N, 8), 128)   # lane/MXU-friendly M dim
    Fp = _round_up(F, 128)
    Hp = _round_up(H, 128)
    Cp = _round_up(C, 128)

    # Zero-pad + cast matmul operands to bf16; keep biases in f32 (added to f32 accum).
    x_p = _pad2d(x, Np, Fp).astype(jnp.bfloat16)
    a_p = _pad2d(a_hat, Np, Np).astype(jnp.bfloat16)
    w1_p = _pad2d(params["w1"], Fp, Hp).astype(jnp.bfloat16)
    w2_p = _pad2d(params["w2"], Hp, Hp).astype(jnp.bfloat16)
    w3_p = _pad2d(params["w3"], Hp, Hp).astype(jnp.bfloat16)
    b_p = jnp.stack([_pad2d(params[k], 1, Hp)[0]
                     for k in ("b1", "b2", "b3")]).astype(jnp.float32)            # (3, Hp)
    wl = params["wl"]                                                             # (3H, C)
    wl_p = jnp.stack([_pad2d(wl[i * H:(i + 1) * H], Hp, Cp)
                      for i in range(3)]).astype(jnp.bfloat16)                    # (3, Hp, Cp)
    bl_p = _pad2d(params["bl"], 1, Cp).astype(jnp.float32)                        # (1, Cp)

    vmem = pl.BlockSpec(memory_space=pltpu.MemorySpace.VMEM)
    out_padded = pl.pallas_call(
        node_gcn_kernel,
        out_shape=jax.ShapeDtypeStruct((Np, Cp), jnp.float32),
        in_specs=[vmem] * 8,
        out_specs=vmem,
    )(x_p, a_p, w1_p, w2_p, w3_p, b_p, wl_p, bl_p)
    return out_padded[:N, :C]


def build_norm_adj(edge_index, num_nodes):
    """Dense D^{-1/2}(A + I)D^{-1/2} matching PyG GCNConv default gcn_norm."""
    src = edge_index[0]
    dst = edge_index[1]
    loop = jnp.arange(num_nodes, dtype=edge_index.dtype)
    src = jnp.concatenate([src, loop])
    dst = jnp.concatenate([dst, loop])
    w = jnp.ones(src.shape[0], dtype=jnp.float32)
    deg = jnp.zeros((num_nodes,), jnp.float32).at[dst].add(w)
    dinv = jnp.where(deg > 0, 1.0 / jnp.sqrt(deg), 0.0)
    norm = dinv[src] * w * dinv[dst]
    # out[i] = sum_{edges j->i} norm * x[j]  =>  A_hat[i, j]
    a_hat = jnp.zeros((num_nodes, num_nodes), jnp.float32).at[dst, src].add(norm)
    return a_hat


def init_params(key, num_features, num_classes, hidden_size):
    ks = jax.random.split(key, 6)

    def glorot(k, shape):
        fan_in, fan_out = shape[0], shape[1]
        lim = jnp.sqrt(6.0 / (fan_in + fan_out))
        return jax.random.uniform(k, shape, jnp.float32, -lim, lim)

    H, C = hidden_size, num_classes
    # GCN weights stored transposed (in, out) so the kernel does h @ W.
    params = {
        "w1": glorot(ks[0], (num_features, H)),
        "b1": jnp.zeros((1, H), jnp.float32),
        "w2": glorot(ks[1], (H, H)),
        "b2": jnp.zeros((1, H), jnp.float32),
        "w3": glorot(ks[2], (H, H)),
        "b3": jnp.zeros((1, H), jnp.float32),
        # Linear(3H -> C), stored (3H, C)
        "wl": glorot(ks[3], (3 * H, C)),
        "bl": jax.random.uniform(ks[4], (1, C), jnp.float32, -0.1, 0.1),
    }
    return params


def node_gcn_reference(x, a_hat, params):
    """Plain-JAX f32 reference matching the PyTorch module semantics."""
    def layer(h, w, b):
        agg = a_hat @ (h @ w) + b
        nrm = jnp.sqrt(jnp.sum(agg * agg, axis=1, keepdims=True))
        return jnp.maximum(agg / jnp.maximum(nrm, EPS), 0.0)

    o1 = layer(x, params["w1"], params["b1"])
    o2 = layer(o1, params["w2"], params["b2"])
    o3 = layer(o2, params["w3"], params["b3"])
    cat = jnp.concatenate([o1, o2, o3], axis=1)
    return cat @ params["wl"] + params["bl"]


if __name__ == "__main__":
    num_nodes = 32
    num_features = 16
    num_classes = 4
    hidden_size = 20
    num_edges = 64

    key = jax.random.PRNGKey(0)
    k_x, k_e, k_p = jax.random.split(key, 3)

    x = jax.random.normal(k_x, (num_nodes, num_features), jnp.float32)
    # Random directed edge list, made symmetric (typical undirected graph input)
    e = jax.random.randint(k_e, (2, num_edges), 0, num_nodes, jnp.int32)
    edge_index = jnp.concatenate([e, e[::-1]], axis=1)

    params = init_params(k_p, num_features, num_classes, hidden_size)
    a_hat = build_norm_adj(edge_index, num_nodes)

    out = node_gcn_forward(x, a_hat, params, hidden_size)
    out = jax.block_until_ready(out)

    ref = node_gcn_reference(x, a_hat, params)
    assert out.shape == (num_nodes, num_classes)
    # bf16 MXU operands vs f32 reference -> loose-but-safe tolerance.
    assert jnp.allclose(out, ref, atol=5e-2, rtol=5e-2), "mismatch vs reference"

    print("KERNEL_OK")
</pallas_src>

<mosaic_0001>
module attributes {stable_mosaic.version = 11 : i64} {
  func.func @node_gcn_kernel(%arg0: memref<128x128xbf16, #tpu.memory_space<vmem>>, %arg1: memref<128x128xbf16, #tpu.memory_space<vmem>>, %arg2: memref<128x128xbf16, #tpu.memory_space<vmem>>, %arg3: memref<128x128xbf16, #tpu.memory_space<vmem>>, %arg4: memref<128x128xbf16, #tpu.memory_space<vmem>>, %arg5: memref<3x128xf32, #tpu.memory_space<vmem>>, %arg6: memref<3x128x128xbf16, #tpu.memory_space<vmem>>, %arg7: memref<1x128xf32, #tpu.memory_space<vmem>>, %arg8: memref<128x128xf32, #tpu.memory_space<vmem>>) attributes {dimension_semantics = [], scalar_prefetch = 0 : i64, scratch_operands = 0 : i64, tpu.core_type = #tpu.core_type<tc>} {
    %c0 = arith.constant 0 : index
    %c0_0 = arith.constant 0 : index
    %0 = vector.load %arg1[%c0, %c0_0] : memref<128x128xbf16, #tpu.memory_space<vmem>>, vector<128x128xbf16>
    %c0_1 = arith.constant 0 : index
    %c0_2 = arith.constant 0 : index
    %1 = vector.load %arg0[%c0_1, %c0_2] : memref<128x128xbf16, #tpu.memory_space<vmem>>, vector<128x128xbf16>
    %c0_3 = arith.constant 0 : index
    %c0_4 = arith.constant 0 : index
    %2 = vector.load %arg2[%c0_3, %c0_4] : memref<128x128xbf16, #tpu.memory_space<vmem>>, vector<128x128xbf16>
    %c0_5 = arith.constant 0 : index
    %c0_6 = arith.constant 0 : index
    %3 = vector.load %arg5[%c0_5, %c0_6] : memref<3x128xf32, #tpu.memory_space<vmem>>, vector<1x128xf32>
    %cst = arith.constant dense<0.000000e+00> : vector<128x128xf32>
    %4 = tpu.matmul %1, %2, %cst {dimension_numbers = #tpu.dot_dimension_numbers<[1], [0], [0], [1], [0, 0, 1, 1], [], []>} : vector<128x128xbf16>, vector<128x128xbf16>, vector<128x128xf32> -> vector<128x128xf32>
    %5 = arith.truncf %4 : vector<128x128xf32> to vector<128x128xbf16>
    %cst_7 = arith.constant dense<0.000000e+00> : vector<128x128xf32>
    %6 = tpu.matmul %0, %5, %cst_7 {dimension_numbers = #tpu.dot_dimension_numbers<[1], [0], [0], [1], [0, 0, 1, 1], [], []>} : vector<128x128xbf16>, vector<128x128xbf16>, vector<128x128xf32> -> vector<128x128xf32>
    %7 = vector.broadcast %3 : vector<1x128xf32> to vector<128x128xf32>
    %8 = arith.addf %6, %7 : vector<128x128xf32>
    %9 = arith.mulf %8, %8 : vector<128x128xf32>
    %cst_8 = arith.constant dense<0.000000e+00> : vector<128xf32>
    %10 = vector.multi_reduction <add>, %9, %cst_8 [1] : vector<128x128xf32> to vector<128xf32>
    %11 = vector.shape_cast %10 : vector<128xf32> to vector<128x1xf32>
    %cst_9 = arith.constant 1.000000e-24 : f32
    %12 = vector.broadcast %cst_9 : f32 to vector<128x1xf32>
    %13 = arith.maximumf %11, %12 : vector<128x1xf32>
    %14 = math.rsqrt %13 : vector<128x1xf32>
    %15 = vector.broadcast %14 : vector<128x1xf32> to vector<128x128xf32>
    %16 = arith.mulf %8, %15 : vector<128x128xf32>
    %cst_10 = arith.constant 0.000000e+00 : f32
    %17 = vector.broadcast %cst_10 : f32 to vector<128x128xf32>
    %18 = arith.maximumf %16, %17 : vector<128x128xf32>
    %19 = arith.truncf %18 : vector<128x128xf32> to vector<128x128xbf16>
    %c0_11 = arith.constant 0 : index
    %c0_12 = arith.constant 0 : index
    %c0_13 = arith.constant 0 : index
    %20 = vector.load %arg6[%c0_11, %c0_12, %c0_13] : memref<3x128x128xbf16, #tpu.memory_space<vmem>>, vector<1x128x128xbf16>
    %21 = vector.shape_cast %20 : vector<1x128x128xbf16> to vector<128x128xbf16>
    %cst_14 = arith.constant dense<0.000000e+00> : vector<128x128xf32>
    %22 = tpu.matmul %19, %21, %cst_14 {dimension_numbers = #tpu.dot_dimension_numbers<[1], [0], [0], [1], [0, 0, 1, 1], [], []>} : vector<128x128xbf16>, vector<128x128xbf16>, vector<128x128xf32> -> vector<128x128xf32>
    %c0_15 = arith.constant 0 : index
    %c0_16 = arith.constant 0 : index
    %23 = vector.load %arg3[%c0_15, %c0_16] : memref<128x128xbf16, #tpu.memory_space<vmem>>, vector<128x128xbf16>
    %c1 = arith.constant 1 : index
    %c0_17 = arith.constant 0 : index
    %24 = vector.load %arg5[%c1, %c0_17] : memref<3x128xf32, #tpu.memory_space<vmem>>, vector<1x128xf32>
    %cst_18 = arith.constant dense<0.000000e+00> : vector<128x128xf32>
    %25 = tpu.matmul %19, %23, %cst_18 {dimension_numbers = #tpu.dot_dimension_numbers<[1], [0], [0], [1], [0, 0, 1, 1], [], []>} : vector<128x128xbf16>, vector<128x128xbf16>, vector<128x128xf32> -> vector<128x128xf32>
    %26 = arith.truncf %25 : vector<128x128xf32> to vector<128x128xbf16>
    %cst_19 = arith.constant dense<0.000000e+00> : vector<128x128xf32>
    %27 = tpu.matmul %0, %26, %cst_19 {dimension_numbers = #tpu.dot_dimension_numbers<[1], [0], [0], [1], [0, 0, 1, 1], [], []>} : vector<128x128xbf16>, vector<128x128xbf16>, vector<128x128xf32> -> vector<128x128xf32>
    %28 = vector.broadcast %24 : vector<1x128xf32> to vector<128x128xf32>
    %29 = arith.addf %27, %28 : vector<128x128xf32>
    %30 = arith.mulf %29, %29 : vector<128x128xf32>
    %cst_20 = arith.constant dense<0.000000e+00> : vector<128xf32>
    %31 = vector.multi_reduction <add>, %30, %cst_20 [1] : vector<128x128xf32> to vector<128xf32>
    %32 = vector.shape_cast %31 : vector<128xf32> to vector<128x1xf32>
    %cst_21 = arith.constant 1.000000e-24 : f32
    %33 = vector.broadcast %cst_21 : f32 to vector<128x1xf32>
    %34 = arith.maximumf %32, %33 : vector<128x1xf32>
    %35 = math.rsqrt %34 : vector<128x1xf32>
    %36 = vector.broadcast %35 : vector<128x1xf32> to vector<128x128xf32>
    %37 = arith.mulf %29, %36 : vector<128x128xf32>
    %cst_22 = arith.constant 0.000000e+00 : f32
    %38 = vector.broadcast %cst_22 : f32 to vector<128x128xf32>
    %39 = arith.maximumf %37, %38 : vector<128x128xf32>
    %40 = arith.truncf %39 : vector<128x128xf32> to vector<128x128xbf16>
    %c1_23 = arith.constant 1 : index
    %c0_24 = arith.constant 0 : index
    %c0_25 = arith.constant 0 : index
    %41 = vector.load %arg6[%c1_23, %c0_24, %c0_25] : memref<3x128x128xbf16, #tpu.memory_space<vmem>>, vector<1x128x128xbf16>
    %42 = vector.shape_cast %41 : vector<1x128x128xbf16> to vector<128x128xbf16>
    %cst_26 = arith.constant dense<0.000000e+00> : vector<128x128xf32>
    %43 = tpu.matmul %40, %42, %cst_26 {dimension_numbers = #tpu.dot_dimension_numbers<[1], [0], [0], [1], [0, 0, 1, 1], [], []>} : vector<128x128xbf16>, vector<128x128xbf16>, vector<128x128xf32> -> vector<128x128xf32>
    %44 = arith.addf %22, %43 : vector<128x128xf32>
    %c0_27 = arith.constant 0 : index
    %c0_28 = arith.constant 0 : index
    %45 = vector.load %arg4[%c0_27, %c0_28] : memref<128x128xbf16, #tpu.memory_space<vmem>>, vector<128x128xbf16>
    %c2 = arith.constant 2 : index
    %c0_29 = arith.constant 0 : index
    %46 = vector.load %arg5[%c2, %c0_29] : memref<3x128xf32, #tpu.memory_space<vmem>>, vector<1x128xf32>
    %cst_30 = arith.constant dense<0.000000e+00> : vector<128x128xf32>
    %47 = tpu.matmul %40, %45, %cst_30 {dimension_numbers = #tpu.dot_dimension_numbers<[1], [0], [0], [1], [0, 0, 1, 1], [], []>} : vector<128x128xbf16>, vector<128x128xbf16>, vector<128x128xf32> -> vector<128x128xf32>
    %48 = arith.truncf %47 : vector<128x128xf32> to vector<128x128xbf16>
    %cst_31 = arith.constant dense<0.000000e+00> : vector<128x128xf32>
    %49 = tpu.matmul %0, %48, %cst_31 {dimension_numbers = #tpu.dot_dimension_numbers<[1], [0], [0], [1], [0, 0, 1, 1], [], []>} : vector<128x128xbf16>, vector<128x128xbf16>, vector<128x128xf32> -> vector<128x128xf32>
    %50 = vector.broadcast %46 : vector<1x128xf32> to vector<128x128xf32>
    %51 = arith.addf %49, %50 : vector<128x128xf32>
    %52 = arith.mulf %51, %51 : vector<128x128xf32>
    %cst_32 = arith.constant dense<0.000000e+00> : vector<128xf32>
    %53 = vector.multi_reduction <add>, %52, %cst_32 [1] : vector<128x128xf32> to vector<128xf32>
    %54 = vector.shape_cast %53 : vector<128xf32> to vector<128x1xf32>
    %cst_33 = arith.constant 1.000000e-24 : f32
    %55 = vector.broadcast %cst_33 : f32 to vector<128x1xf32>
    %56 = arith.maximumf %54, %55 : vector<128x1xf32>
    %57 = math.rsqrt %56 : vector<128x1xf32>
    %58 = vector.broadcast %57 : vector<128x1xf32> to vector<128x128xf32>
    %59 = arith.mulf %51, %58 : vector<128x128xf32>
    %cst_34 = arith.constant 0.000000e+00 : f32
    %60 = vector.broadcast %cst_34 : f32 to vector<128x128xf32>
    %61 = arith.maximumf %59, %60 : vector<128x128xf32>
    %62 = arith.truncf %61 : vector<128x128xf32> to vector<128x128xbf16>
    %c2_35 = arith.constant 2 : index
    %c0_36 = arith.constant 0 : index
    %c0_37 = arith.constant 0 : index
    %63 = vector.load %arg6[%c2_35, %c0_36, %c0_37] : memref<3x128x128xbf16, #tpu.memory_space<vmem>>, vector<1x128x128xbf16>
    %64 = vector.shape_cast %63 : vector<1x128x128xbf16> to vector<128x128xbf16>
    %cst_38 = arith.constant dense<0.000000e+00> : vector<128x128xf32>
    %65 = tpu.matmul %62, %64, %cst_38 {dimension_numbers = #tpu.dot_dimension_numbers<[1], [0], [0], [1], [0, 0, 1, 1], [], []>} : vector<128x128xbf16>, vector<128x128xbf16>, vector<128x128xf32> -> vector<128x128xf32>
    %66 = arith.addf %44, %65 : vector<128x128xf32>
    %c0_39 = arith.constant 0 : index
    %c0_40 = arith.constant 0 : index
    %67 = vector.load %arg7[%c0_39, %c0_40] : memref<1x128xf32, #tpu.memory_space<vmem>>, vector<1x128xf32>
    %68 = vector.broadcast %67 : vector<1x128xf32> to vector<128x128xf32>
    %69 = arith.addf %66, %68 : vector<128x128xf32>
    %c0_41 = arith.constant 0 : index
    %c0_42 = arith.constant 0 : index
    %70 = vector.load %arg8[%c0_41, %c0_42] : memref<128x128xf32, #tpu.memory_space<vmem>>, vector<128x128xf32>
    tpu.vector_store %arg8[%c0_41, %c0_42], %69 {strides = array<i32>} : memref<128x128xf32, #tpu.memory_space<vmem>>, vector<128x128xf32>,
    return
  }
}

</mosaic_0001>

<bundles_post_ra>
// kernel: tpu_custom_call.1
= control target key start
LH: loop header
LB: loop body
LE: loop exit
PB: predicated region body
PF: predicated region fallthrough
CT: control target
= control target key end

     0   :  { %13 = vsyncpa [#allocation3], 0  ;;  %s3438_s0 = inlined_call_operand.hbm [shape: bf16[128,128], index: 0, kind: input, shape index: {}]   ;;  %s3439_s1 = inlined_call_operand.hbm [shape: bf16[128,128], index: 1, kind: input, shape index: {}]   ;;  %s3440_s2 = inlined_call_operand.hbm [shape: bf16[128,128], index: 2, kind: input, shape index: {}]   ;;  %s3441_s3 = inlined_call_operand.hbm [shape: bf16[128,128], index: 3, kind: input, shape index: {}]   ;;  %s3442_s4 = inlined_call_operand.hbm [shape: bf16[128,128], index: 4, kind: input, shape index: {}]   ;;  %s3443_s5 = inlined_call_operand.vmem [shape: f32[3,128], index: 5, kind: input, shape index: {}]   ;;  %s3444_s6 = inlined_call_operand.hbm [shape: bf16[3,128,128], index: 6, kind: input, shape index: {}]   ;;  %s3445_s7 = inlined_call_operand.vmem [shape: f32[1,128], index: 7, kind: input, shape index: {}]   ;;  %s3446_s8 = inlined_call_operand.hbm [shape: f32[128,128], index: 8, kind: output, shape index: {}]  }
   0x1   :  { %14 = vsyncpa [#allocation6], 0 }
   0x2   :  { %15 = vsyncpa [#allocation9], 0 }
   0x3   :  { %16 = vsyncpa [#allocation12], 0 }
   0x4   :  { %17 = vsyncpa [#allocation4], 0  ;;  %s2865_s27 = smov [#allocation5]   ;;  %s2866_s29 = smov [#allocation8]  }
   0x5   :  { %s35_s28 = sshll.u32 %s2865_s27, 4  ;;  %s59_s30 = sshll.u32 %s2866_s29, 4  ;;  %s36_s28 = int_to_ptr.vmem [resolvable:$true] %s35_s28  ;;  %s2921_s30 = int_to_ptr.vmem [resolvable:$true] %s59_s30 }
   0x6   :  { %s2701_s11 = scalar_lea.hbm %s3439_s1, 1024 }
   0x7   :  { %p2702_p0 = scmp.ne.s32.totalorder %s3439_s1, %s2701_s11  ;;  %p2705_p1 = scmp.lt.u32.totalorder %s2701_s11, %s3439_s1 }
   0x9   :  { %p2707_p2 = pnand %p2705_p1, %p2702_p0 }
   0xb   :  { %2710 = shalt.err (!%p2707_p2)
}
   0xc   :  { %s2711_s16 = scalar_lea.vmem %s36_s28, 1024  ;;  %p2716_p4 = scmp.lt.s32.totalorder %s36_s28, %s36_s28 }
   0xd   :  { %p2712_p3 = scmp.ne.s32.totalorder %s36_s28, %s2711_s16  ;;  %p2717_p5 = scmp.lt.s32.totalorder %s2711_s16, %s2711_s16 }
   0xf   :  { %p2718_p6 = por %p2717_p5, %p2716_p4 }
  0x11   :  { %p2719_p7 = pnand %p2718_p6, %p2712_p3 }
  0x13   :  { %2722 = shalt.err (!%p2719_p7)
}
  0x14   :  { %s2867_s17 = smov 64   ;;  %s2868_s18 = smov 4  }
  0x15   :  { %41 = dma.hbm_to_vmem [thread:$0]  %s3439_s1, 1024, %s36_s28, [#allocation6], %s2867_s17, %s2867_s17, %s2868_s18  }
  0x16   :  { %s2723_s23 = scalar_lea.hbm %s3441_s3, 1024 }
  0x17   :  { %p2724_p8 = scmp.ne.s32.totalorder %s3441_s3, %s2723_s23  ;;  %p2727_p9 = scmp.lt.u32.totalorder %s2723_s23, %s3441_s3 }
  0x19   :  { %p2729_p10 = pnand %p2727_p9, %p2724_p8 }
  0x1b   :  { %2732 = shalt.err (!%p2729_p10)
}
  0x1c   :  { %s2733_s29 = scalar_lea.vmem %s2921_s30, 1024  ;;  %p2738_p12 = scmp.lt.s32.totalorder %s2921_s30, %s2921_s30 }
  0x1d   :  { %p2734_p11 = scmp.ne.s32.totalorder %s2921_s30, %s2733_s29  ;;  %p2739_p13 = scmp.lt.s32.totalorder %s2733_s29, %s2733_s29 }
  0x1f   :  { %p2740_p0 = por %p2739_p13, %p2738_p12 }
  0x21   :  { %p2741_p1 = pnand %p2740_p0, %p2734_p11 }
  0x23   :  { %2744 = shalt.err (!%p2741_p1)
}
  0x24   :  { %65 = dma.hbm_to_vmem [thread:$0]  %s3441_s3, 1024, %s2921_s30, [#allocation9], %s2867_s17, %s2867_s17, %s2868_s18  }
  0x25   :  { %s2869_s9 = smov [#allocation2]   ;;  %s2870_s11 = smov [#allocation7]  }
  0x26   :  { %s23_s10 = sshll.u32 %s2869_s9, 4  ;;  %s47_s12 = sshll.u32 %s2870_s11, 4  ;;  %s24_s10 = int_to_ptr.vmem [resolvable:$true] %s23_s10  ;;  %s2958_s12 = int_to_ptr.vmem [resolvable:$true] %s47_s12 }
  0x27   :  { %s2745_s15 = scalar_lea.hbm %s3438_s0, 1024 }
  0x28   :  { %p2746_p2 = scmp.ne.s32.totalorder %s3438_s0, %s2745_s15  ;;  %p2749_p3 = scmp.lt.u32.totalorder %s2745_s15, %s3438_s0 }
  0x2a   :  { %p2751_p4 = pnand %p2749_p3, %p2746_p2 }
  0x2c   :  { %2754 = shalt.err (!%p2751_p4)
}
  0x2d   :  { %s2755_s3 = scalar_lea.vmem %s24_s10, 1024  ;;  %p2760_p6 = scmp.lt.s32.totalorder %s24_s10, %s24_s10 }
  0x2e   :  { %p2756_p5 = scmp.ne.s32.totalorder %s24_s10, %s2755_s3  ;;  %p2761_p7 = scmp.lt.s32.totalorder %s2755_s3, %s2755_s3 }
  0x30   :  { %p2762_p8 = por %p2761_p7, %p2760_p6 }
  0x32   :  { %p2763_p9 = pnand %p2762_p8, %p2756_p5 }
  0x34   :  { %2766 = shalt.err (!%p2763_p9)
}
  0x35   :  { %29 = dma.hbm_to_vmem [thread:$0]  %s3438_s0, 1024, %s24_s10, [#allocation3], %s2867_s17, %s2867_s17, %s2868_s18  }
  0x36   :  { %s2767_s25 = scalar_lea.hbm %s3440_s2, 1024 }
  0x37   :  { %p2768_p10 = scmp.ne.s32.totalorder %s3440_s2, %s2767_s25  ;;  %p2771_p11 = scmp.lt.u32.totalorder %s2767_s25, %s3440_s2 }
  0x39   :  { %p2773_p12 = pnand %p2771_p11, %p2768_p10 }
  0x3b   :  { %2776 = shalt.err (!%p2773_p12)
}
  0x3c   :  { %s2777_s28 = scalar_lea.vmem %s2958_s12, 1024  ;;  %p2782_p0 = scmp.lt.s32.totalorder %s2958_s12, %s2958_s12 }
  0x3d   :  { %p2778_p13 = scmp.ne.s32.totalorder %s2958_s12, %s2777_s28  ;;  %p2783_p1 = scmp.lt.s32.totalorder %s2777_s28, %s2777_s28 }
  0x3f   :  { %p2784_p2 = por %p2783_p1, %p2782_p0 }
  0x41   :  { %p2785_p3 = pnand %p2784_p2, %p2778_p13 }
  0x43   :  { %2788 = shalt.err (!%p2785_p3)
}
  0x44   :  { %53 = dma.hbm_to_vmem [thread:$0]  %s3440_s2, 1024, %s2958_s12, [#allocation6], %s2867_s17, %s2867_s17, %s2868_s18  }
  0x45   :  { %s2871_s10 = smov [#allocation10]   ;;  %s2872_s13 = smov [#allocation11]  }
  0x46   :  { %s71_s11 = sshll.u32 %s2871_s10, 4  ;;  %s85_s14 = sshll.u32 %s2872_s13, 4  ;;  %s72_s11 = int_to_ptr.vmem [resolvable:$true] %s71_s11  ;;  %s2995_s14 = int_to_ptr.vmem [resolvable:$true] %s85_s14 }
  0x47   :  { %s2789_s19 = scalar_lea.hbm %s3442_s4, 1024 }
  0x48   :  { %p2790_p4 = scmp.ne.s32.totalorder %s3442_s4, %s2789_s19  ;;  %p2793_p5 = scmp.lt.u32.totalorder %s2789_s19, %s3442_s4 }
  0x4a   :  { %p2795_p6 = pnand %p2793_p5, %p2790_p4 }
  0x4c   :  { %2798 = shalt.err (!%p2795_p6)
}
  0x4d   :  { %s2799_s2 = scalar_lea.vmem %s72_s11, 1024  ;;  %p2804_p8 = scmp.lt.s32.totalorder %s72_s11, %s72_s11 }
  0x4e   :  { %p2800_p7 = scmp.ne.s32.totalorder %s72_s11, %s2799_s2  ;;  %p2805_p9 = scmp.lt.s32.totalorder %s2799_s2, %s2799_s2 }
  0x50   :  { %p2806_p10 = por %p2805_p9, %p2804_p8 }
  0x52   :  { %p2807_p11 = pnand %p2806_p10, %p2800_p7 }
  0x54   :  { %2810 = shalt.err (!%p2807_p11)
}
  0x55   :  { %77 = dma.hbm_to_vmem [thread:$0]  %s3442_s4, 1024, %s72_s11, [#allocation9], %s2867_s17, %s2867_s17, %s2868_s18  }
  0x56   :  { %s2811_s25 = scalar_lea.hbm %s3444_s6, 3072 }
  0x57   :  { %p2812_p12 = scmp.ne.s32.totalorder %s3444_s6, %s2811_s25  ;;  %p2815_p13 = scmp.lt.u32.totalorder %s2811_s25, %s3444_s6 }
  0x59   :  { %p2817_p0 = pnand %p2815_p13, %p2812_p12 }
  0x5b   :  { %2820 = shalt.err (!%p2817_p0)
}
  0x5c   :  { %s2821_s28 = scalar_lea.vmem %s2995_s14, 3072  ;;  %p2826_p2 = scmp.lt.s32.totalorder %s2995_s14, %s2995_s14 }
  0x5d   :  { %p2822_p1 = scmp.ne.s32.totalorder %s2995_s14, %s2821_s28  ;;  %p2827_p3 = scmp.lt.s32.totalorder %s2821_s28, %s2821_s28 }
  0x5f   :  { %p2828_p4 = por %p2827_p3, %p2826_p2 }
  0x61   :  { %p2829_p5 = pnand %p2828_p4, %p2822_p1 }
  0x63   :  { %2832 = shalt.err (!%p2829_p5)
}
  0x64   :  { %91 = dma.hbm_to_vmem [thread:$0]  %s3444_s6, 3072, %s2995_s14, [#allocation12], %s2867_s17, %s2867_s17, %s2868_s18  }
  0x65   :  { %2855 = dma.done.wait [#allocation3], 1024  }
  0x66   :  { %2856 = vsyncadd [#allocation3], 4294966272 }
  0x67   :  { %2857 = dma.done.wait [#allocation6], 2048  }
  0x68   :  { %2858 = vsyncadd [#allocation6], 4294965248 }
  0x69   :  { %2859 = dma.done.wait [#allocation9], 2048  }
  0x6a   :  { %2860 = vsyncadd [#allocation9], 4294965248 }
  0x6b   :  { %2861 = dma.done.wait [#allocation12], 3072  }
  0x6c   :  { %2862 = vsyncadd [#allocation12], 4294964224  ;;  %v2533_v0 = vld [vmem:[#allocation7] sm:$0xff]   ;;  %v2534_v1 = vld [vmem:[#allocation7 + $0x8] sm:$0xff]  }
  0x6d   :  { %2186 = vmatprep.subr.bf16.mxu0 %v2533_v0  ;;  %v2535_v2 = vld [vmem:[#allocation7 + $0x10] sm:$0xff]   ;;  %v2536_v3 = vld [vmem:[#allocation7 + $0x18] sm:$0xff]   ;;  %v2541_v4 = vld [vmem:[#allocation2] sm:$0xff]  }
  0x6e   :  { %2187 = vmatpush3.bf16.msra.mxu0 %v2533_v0  ;;  %2202 = vmatprep.mubr.bf16.mxu0 %v2541_v4  ;;  %v2537_v5 = vld [vmem:[#allocation7 + $0x20] sm:$0xff]   ;;  %v2538_v6 = vld [vmem:[#allocation7 + $0x28] sm:$0xff]   ;;  %v2539_v7 = vld [vmem:[#allocation7 + $0x30] sm:$0xff]  }
  0x6f   :  { %2188 = vmatprep.subr.bf16.mxu0 %v2534_v1  ;;  %v2540_v8 = vld [vmem:[#allocation7 + $0x38] sm:$0xff]   ;;  %v2542_v9 = vld [vmem:[#allocation2 + $0x8] sm:$0xff]   ;;  %v2543_v10 = vld [vmem:[#allocation2 + $0x10] sm:$0xff]  }
  0x70   :  { %v2544_v11 = vld [vmem:[#allocation2 + $0x18] sm:$0xff]   ;;  %v2545_v12 = vld [vmem:[#allocation2 + $0x20] sm:$0xff]   ;;  %v2546_v13 = vld [vmem:[#allocation2 + $0x28] sm:$0xff]  }
  0x71   :  { %v2547_v14 = vld [vmem:[#allocation2 + $0x30] sm:$0xff]   ;;  %v2548_v15 = vld [vmem:[#allocation2 + $0x38] sm:$0xff]   ;;  %v2549_v16 = vld [vmem:[#allocation5] sm:$0xff]  }
  0x72   :  { %2189 = vmatpush3.bf16.msra.mxu0 %v2534_v1  ;;  %2234 = vmatprep.mubr.bf16.mxu1 %v2549_v16  ;;  %v3032_v41 = vld [vmem:[#allocation5 + $0x8] sm:$0xff]   ;;  %v3034_v42 = vld [vmem:[#allocation5 + $0x10] sm:$0xff]   ;;  %v3038_v43 = vld [vmem:[#allocation5 + $0x18] sm:$0xff]  }
  0x73   :  { %2190 = vmatprep.subr.bf16.mxu0 %v2535_v2  ;;  %v3040_v44 = vld [vmem:[#allocation5 + $0x20] sm:$0xff]   ;;  %v3044_v45 = vld [vmem:[#allocation5 + $0x28] sm:$0xff]   ;;  %v3046_v46 = vld [vmem:[#allocation5 + $0x30] sm:$0xff]  }
  0x74   :  { %v3050_v47 = vld [vmem:[#allocation5 + $0x38] sm:$0xff]   ;;  %v2557_v48 = vld [vmem:[#allocation8] sm:$0xff]   ;;  %v2558_v49 = vld [vmem:[#allocation8 + $0x8] sm:$0xff]  }
  0x75   :  { %v3056_v50 = vld [vmem:[%s3443_s5] ss:$0 sm:$0xff] }
  0x76   :  { %2191 = vmatpush3.bf16.msra.mxu0 %v2535_v2 }
  0x77   :  { %2192 = vmatprep.subr.bf16.mxu0 %v2536_v3 }
  0x7a   :  { %2193 = vmatpush3.bf16.msra.mxu0 %v2536_v3 }
  0x7b   :  { %2194 = vmatprep.subr.bf16.mxu0 %v2537_v5 }
  0x7e   :  { %2195 = vmatpush3.bf16.msra.mxu0 %v2537_v5 }
  0x7f   :  { %2196 = vmatprep.subr.bf16.mxu0 %v2538_v6 }
  0x82   :  { %2197 = vmatpush3.bf16.msra.mxu0 %v2538_v6 }
  0x83   :  { %2198 = vmatprep.subr.bf16.mxu0 %v2539_v7 }
  0x86   :  { %2199 = vmatpush3.bf16.msra.mxu0 %v2539_v7 }
  0x87   :  { %2200 = vmatprep.subr.bf16.mxu0 %v2540_v8 }
  0x8a   :  { %2201 = vmatpush3.bf16.msra.mxu0 %v2540_v8 }
  0x8b   :  { %2250 = vmatprep.subr.bf16.mxu0 %v2557_v48 }
  0x8d   :  { %2203 = vmatmul.mubr.bf16.vlgmr.msra.gmra.mrb[0].mxu0 %v2542_v9 }
  0x8e   :  { %2206 = vmatprep.mubr.bf16.mxu0 %v2543_v10  ;;  %2251 = vmatpush3.bf16.msra.mxu0 %v2557_v48 }
  0x8f   :  { %2252 = vmatprep.subr.bf16.mxu0 %v2558_v49 }
  0x92   :  { %2253 = vmatpush3.bf16.msra.mxu0 %v2558_v49 }
  0x95   :  { %2207 = vmatmul.mubr.bf16.gmra.mrb[4].mxu0 %v2544_v11 }
  0x96   :  { %2210 = vmatprep.mubr.bf16.mxu0 %v2545_v12 }
  0x9d   :  { %2211 = vmatmul.mubr.bf16.gmra.mrb[8].mxu0 %v2546_v13 }
  0x9e   :  { %2214 = vmatprep.mubr.bf16.mxu0 %v2547_v14 }
  0xa5   :  { %2215 = vmatmul.mubr.bf16.gmra.mrb[12].mxu0 %v2548_v15  ;;  %v2559_v15 = vld [vmem:[#allocation8 + $0x10] sm:$0xff]  }
  0xa6   :  { %2254 = vmatprep.subr.bf16.mxu0 %v2559_v15 }
  0xa7   :  { %2255 = vmatpush3.bf16.msra.mxu0 %v2559_v15 }
 0x160   :  { %v2204_v17 = vpop.f32.mrb[0].mxu0 }
 0x161   :  { %v292_v18 = vpop.f32.mrb[1].mxu0 }
 0x162   :  { %v2205_v19 = vpop.f32.mrb[2].mxu0 }
 0x163   :  { %v356_v20 = vpack.c.bf16 %v2205_v19, %v2204_v17  ;;  %v295_v21 = vpop.f32.mrb[3].mxu0 }
 0x164   :  { %v355_v22 = vpack.c.bf16 %v295_v21, %v292_v18 }
 0x166   :  { %2218 = vmatprep.subr.bf16.mxu1 %v355_v22 }
 0x167   :  { %2219 = vmatpush3.bf16.msra.mxu1 %v355_v22  ;;  %v2560_v22 = vld [vmem:[#allocation8 + $0x18] sm:$0xff]  }
 0x168   :  { %v2208_v23 = vpop.f32.mrb[4].mxu0  ;;  %2220 = vmatprep.subr.bf16.mxu1 %v356_v20  ;;  %2256 = vmatprep.subr.bf16.mxu0 %v2560_v22 }
 0x169   :  { %v308_v24 = vpop.f32.mrb[5].mxu0  ;;  %2257 = vmatpush3.bf16.msra.mxu0 %v2560_v22 }
 0x16a   :  { %v2209_v25 = vpop.f32.mrb[6].mxu0 }
 0x16b   :  { %v358_v26 = vpack.c.bf16 %v2209_v25, %v2208_v23  ;;  %v311_v27 = vpop.f32.mrb[7].mxu0  ;;  %2221 = vmatpush3.bf16.msra.mxu1 %v356_v20 }
 0x16c   :  { %v357_v28 = vpack.c.bf16 %v311_v27, %v308_v24 }
 0x16e   :  { %2222 = vmatprep.subr.bf16.mxu1 %v357_v28 }
 0x16f   :  { %2223 = vmatpush3.bf16.msra.mxu1 %v357_v28 }
 0x170   :  { %v2212_v29 = vpop.f32.mrb[8].mxu0  ;;  %2224 = vmatprep.subr.bf16.mxu1 %v358_v26 }
 0x171   :  { %v324_v30 = vpop.f32.mrb[9].mxu0 }
 0x172   :  { %v2213_v31 = vpop.f32.mrb[10].mxu0 }
 0x173   :  { %v360_v32 = vpack.c.bf16 %v2213_v31, %v2212_v29  ;;  %v327_v33 = vpop.f32.mrb[11].mxu0  ;;  %2225 = vmatpush3.bf16.msra.mxu1 %v358_v26  ;;  %v2561_v29 = vld [vmem:[#allocation8 + $0x20] sm:$0xff]  }
 0x174   :  { %v359_v34 = vpack.c.bf16 %v327_v33, %v324_v30  ;;  %2258 = vmatprep.subr.bf16.mxu0 %v2561_v29 }
 0x175   :  { %2259 = vmatpush3.bf16.msra.mxu0 %v2561_v29 }
 0x176   :  { %2226 = vmatprep.subr.bf16.mxu1 %v359_v34 }
 0x177   :  { %2227 = vmatpush3.bf16.msra.mxu1 %v359_v34 }
 0x178   :  { %v2216_v35 = vpop.f32.mrb[12].mxu0  ;;  %2228 = vmatprep.subr.bf16.mxu1 %v360_v32 }
 0x179   :  { %v340_v36 = vpop.f32.mrb[13].mxu0 }
 0x17a   :  { %v2217_v37 = vpop.f32.mrb[14].mxu0 }
 0x17b   :  { %v362_v38 = vpack.c.bf16 %v2217_v37, %v2216_v35  ;;  %v343_v39 = vpop.f32.mrb[15].mxu0  ;;  %2229 = vmatpush3.bf16.msra.mxu1 %v360_v32 }
 0x17c   :  { %v361_v40 = vpack.c.bf16 %v343_v39, %v340_v36  ;;  %v2562_v36 = vld [vmem:[#allocation8 + $0x28] sm:$0xff]   ;;  %v2563_v39 = vld [vmem:[#allocation8 + $0x30] sm:$0xff]  }
 0x17d   :  { %2260 = vmatprep.subr.bf16.mxu0 %v2562_v36 }
 0x17e   :  { %2230 = vmatprep.subr.bf16.mxu1 %v361_v40  ;;  %2261 = vmatpush3.bf16.msra.mxu0 %v2562_v36 }
 0x17f   :  { %2231 = vmatpush3.bf16.msra.mxu1 %v361_v40  ;;  %2262 = vmatprep.subr.bf16.mxu0 %v2563_v39  ;;  %v2564_v40 = vld [vmem:[#allocation8 + $0x38] sm:$0xff]  }
 0x180   :  { %2232 = vmatprep.subr.bf16.mxu1 %v362_v38 }
 0x182   :  { %2263 = vmatpush3.bf16.msra.mxu0 %v2563_v39 }
 0x183   :  { %2233 = vmatpush3.bf16.msra.mxu1 %v362_v38  ;;  %2264 = vmatprep.subr.bf16.mxu0 %v2564_v40 }
 0x186   :  { %2235 = vmatmul.mubr.bf16.vlgmr.msra.gmra.mrb[0].mxu1 %v3032_v41  ;;  %2265 = vmatpush3.bf16.msra.mxu0 %v2564_v40 }
 0x187   :  { %2238 = vmatprep.mubr.bf16.mxu1 %v3034_v42 }
 0x18e   :  { %2239 = vmatmul.mubr.bf16.gmra.mrb[4].mxu1 %v3038_v43 }
 0x18f   :  { %2242 = vmatprep.mubr.bf16.mxu1 %v3040_v44 }
 0x196   :  { %2243 = vmatmul.mubr.bf16.gmra.mrb[8].mxu1 %v3044_v45 }
 0x197   :  { %2246 = vmatprep.mubr.bf16.mxu1 %v3046_v46 }
 0x19e   :  { %2247 = vmatmul.mubr.bf16.gmra.mrb[12].mxu1 %v3050_v47 }
 0x19f   :  { %2298 = vmatprep.mubr.bf16.mxu1 %v2549_v16 }
 0x259   :  { %v2236_v51 = vpop.f32.mrb[0].mxu1 }
 0x25a   :  { %v3059_v52 = vadd.f32 %v2236_v51, %v3056_v50  ;;  %v449_v53 = vpop.f32.mrb[1].mxu1 }
 0x25b   :  { %v3062_v54 = vadd.f32 %v3056_v50, %v449_v53  ;;  %v2237_v55 = vpop.f32.mrb[2].mxu1 }
 0x25c   :  { %v3065_v56 = vadd.f32 %v2237_v55, %v3056_v50  ;;  %v452_v57 = vpop.f32.mrb[3].mxu1  ;;  %v514_v58 = vmul.f32 %v3059_v52, %v3059_v52 }
 0x25d   :  { %v3070_v59 = vadd.f32 %v3056_v50, %v452_v57  ;;  %v512_v60 = vmul.f32 %v3062_v54, %v3062_v54 }
 0x25e   :  { %532 = vadd.xlane.f32.xlu1 %v514_v58  ;;  %v515_v61 = vmul.f32 %v3065_v56, %v3065_v56 }
 0x25f   :  { %528 = vadd.xlane.f32.xlu0 %v512_v60  ;;  %v513_v63 = vmul.f32 %v3070_v59, %v3070_v59 }
 0x261   :  { %v2240_v62 = vpop.f32.mrb[4].mxu1 }
 0x262   :  { %534 = vadd.xlane.f32.xlu1 %v515_v61  ;;  %v465_v0 = vpop.f32.mrb[5].mxu1  ;;  %v3082_v4 = vadd.f32 %v2240_v62, %v3056_v50 }
 0x263   :  { %v3079_v1 = vadd.f32 %v3056_v50, %v465_v0  ;;  %v2241_v2 = vpop.f32.mrb[6].mxu1  ;;  %530 = vadd.xlane.f32.xlu0 %v513_v63 }
 0x264   :  { %v468_v3 = vpop.f32.mrb[7].mxu1  ;;  %v3090_v7 = vadd.f32 %v2241_v2, %v3056_v50  ;;  %v518_v10 = vmul.f32 %v3082_v4, %v3082_v4 }
 0x265   :  { %v3085_v5 = vadd.f32 %v3056_v50, %v468_v3  ;;  %v516_v6 = vmul.f32 %v3079_v1, %v3079_v1 }
 0x266   :  { %v519_v14 = vmul.f32 %v3090_v7, %v3090_v7 }
 0x267   :  { %536 = vadd.xlane.f32.xlu0 %v516_v6  ;;  %v517_v8 = vmul.f32 %v3085_v5, %v3085_v5 }
 0x269   :  { %v2244_v9 = vpop.f32.mrb[8].mxu1  ;;  %538 = vadd.xlane.f32.xlu1 %v517_v8 }
 0x26a   :  { %v481_v11 = vpop.f32.mrb[9].mxu1  ;;  %v3102_v17 = vadd.f32 %v2244_v9, %v3056_v50 }
 0x26b   :  { %v3097_v12 = vadd.f32 %v3056_v50, %v481_v11  ;;  %v2245_v13 = vpop.f32.mrb[10].mxu1  ;;  %540 = vadd.xlane.f32.xlu0 %v518_v10 }
 0x26c   :  { %v484_v16 = vpop.f32.mrb[11].mxu1  ;;  %v3110_v20 = vadd.f32 %v2245_v13, %v3056_v50  ;;  %v522_v24 = vmul.f32 %v3102_v17, %v3102_v17 }
 0x26d   :  { %v3105_v18 = vadd.f32 %v3056_v50, %v484_v16  ;;  %542 = vadd.xlane.f32.xlu1 %v519_v14  ;;  %v520_v19 = vmul.f32 %v3097_v12, %v3097_v12 }
 0x26e   :  { %v523_v28 = vmul.f32 %v3110_v20, %v3110_v20 }
 0x26f   :  { %544 = vadd.xlane.f32.xlu0 %v520_v19  ;;  %v521_v21 = vmul.f32 %v3105_v18, %v3105_v18 }
 0x271   :  { %v2248_v23 = vpop.f32.mrb[12].mxu1  ;;  %546 = vadd.xlane.f32.xlu1 %v521_v21 }
 0x272   :  { %v497_v25 = vpop.f32.mrb[13].mxu1  ;;  %v3122_v31 = vadd.f32 %v2248_v23, %v3056_v50 }
 0x273   :  { %v3117_v26 = vadd.f32 %v3056_v50, %v497_v25  ;;  %v2249_v27 = vpop.f32.mrb[14].mxu1  ;;  %548 = vadd.xlane.f32.xlu0 %v522_v24 }
 0x274   :  { %v500_v30 = vpop.f32.mrb[15].mxu1  ;;  %v3130_v34 = vadd.f32 %v2249_v27, %v3056_v50  ;;  %v526_v37 = vmul.f32 %v3122_v31, %v3122_v31 }
 0x275   :  { %v3125_v32 = vadd.f32 %v3056_v50, %v500_v30  ;;  %550 = vadd.xlane.f32.xlu1 %v523_v28  ;;  %v524_v33 = vmul.f32 %v3117_v26, %v3117_v26 }
 0x276   :  { %v527_v38 = vmul.f32 %v3130_v34, %v3130_v34 }
 0x277   :  { %552 = vadd.xlane.f32.xlu0 %v524_v33  ;;  %v525_v35 = vmul.f32 %v3125_v32, %v3125_v32 }
 0x279   :  { %554 = vadd.xlane.f32.xlu1 %v525_v35 }
 0x27b   :  { %556 = vadd.xlane.f32.xlu0 %v526_v37 }
 0x27d   :  { %558 = vadd.xlane.f32.xlu1 %v527_v38 }
 0x2eb   :  { %v533_v48 = vpop.xlane.xlu1 %532 }
 0x2ec   :  { %v562_v49 = vmax.f32 %v533_v48, 1e-24  ;;  %v529_v50 = vpop.xlane.xlu0 %528 }
 0x2ed   :  { %v560_v51 = vmax.f32 %v529_v50, 1e-24 }
 0x2ef   :  { %2597 = vrsqrt.f32 %v560_v51  ;;  %v535_v53 = vpop.xlane.xlu1 %534 }
 0x2f0   :  { %2599 = vrsqrt.f32 %v562_v49  ;;  %v563_v55 = vmax.f32 %v535_v53, 1e-24  ;;  %v531_v57 = vpop.xlane.xlu0 %530 }
 0x2f1   :  { %v561_v58 = vmax.f32 %v531_v57, 1e-24 }
 0x2f2   :  { %2601 = vrsqrt.f32 %v563_v55 }
 0x2f3   :  { %2603 = vrsqrt.f32 %v561_v58 }
 0x2f4   :  { %v537_v60 = vpop.xlane.xlu0 %536 }
 0x2f5   :  { %v564_v61 = vmax.f32 %v537_v60, 1e-24 }
 0x2f6   :  { %v539_v62 = vpop.xlane.xlu1 %538 }
 0x2f7   :  { %2605 = vrsqrt.f32 %v564_v61  ;;  %v565_v63 = vmax.f32 %v539_v62, 1e-24 }
 0x2f8   :  { %v541_v0 = vpop.xlane.xlu0 %540 }
 0x2f9   :  { %v2598_v2 = vpop.eup %2597  ;;  %2607 = vrsqrt.f32 %v565_v63  ;;  %v566_v3 = vmax.f32 %v541_v0, 1e-24 }
 0x2fa   :  { %v2600_v6 = vpop.eup %2599  ;;  %v543_v8 = vpop.xlane.xlu1 %542  ;;  %v592_v13 = vmul.f32 %v2598_v2, %v3062_v54 }
 0x2fb   :  { %2609 = vrsqrt.f32 %v566_v3  ;;  %v567_v9 = vmax.f32 %v543_v8, 1e-24  ;;  %v594_v15 = vmul.f32 %v2600_v6, %v3059_v52 }
 0x2fc   :  { %v2602_v10 = vpop.eup %2601  ;;  %v545_v11 = vpop.xlane.xlu0 %544  ;;  %v608_v27 = vmax.f32 %v592_v13, 0.0 }
 0x2fd   :  { %v2604_v14 = vpop.eup %2603  ;;  %v595_v16 = vmul.f32 %v2602_v10, %v3065_v56  ;;  %2611 = vrsqrt.f32 %v567_v9  ;;  %v568_v19 = vmax.f32 %v545_v11, 1e-24  ;;  %v610_v30 = vmax.f32 %v594_v15, 0.0 }
 0x2fe   :  { %v547_v21 = vpop.xlane.xlu1 %546  ;;  %v593_v22 = vmul.f32 %v2604_v14, %v3070_v59 }
 0x2ff   :  { %v611_v23 = vmax.f32 %v595_v16, 0.0  ;;  %2613 = vrsqrt.f32 %v568_v19  ;;  %v569_v24 = vmax.f32 %v547_v21, 1e-24 }
 0x300   :  { %v549_v25 = vpop.xlane.xlu0 %548  ;;  %v609_v28 = vmax.f32 %v593_v22, 0.0 }
 0x301   :  { %v2606_v29 = vpop.eup %2605  ;;  %2615 = vrsqrt.f32 %v569_v24  ;;  %v570_v54 = vmax.f32 %v549_v25, 1e-24  ;;  %v3145_v37 = vpack.c.bf16 %v611_v23, %v610_v30 }
 0x302   :  { %v551_v33 = vpop.xlane.xlu1 %550  ;;  %v3142_v35 = vpack.c.bf16 %v609_v28, %v608_v27  ;;  %v596_v52 = vmul.f32 %v2606_v29, %v3079_v1 }
 0x303   :  { %v2608_v56 = vpop.eup %2607  ;;  %2617 = vrsqrt.f32 %v570_v54  ;;  %v571_v36 = vmax.f32 %v551_v33, 1e-24 }
 0x304   :  { %2266 = vmatprep.mubr.bf16.mxu0 %v3142_v35  ;;  %v553_v59 = vpop.xlane.xlu0 %552  ;;  %v597_v38 = vmul.f32 %v2608_v56, %v3085_v5  ;;  %v612_v49 = vmax.f32 %v596_v52, 0.0 }
 0x305   :  { %v2610_v39 = vpop.eup %2609  ;;  %2619 = vrsqrt.f32 %v571_v36  ;;  %v572_v40 = vmax.f32 %v553_v59, 1e-24  ;;  %2267 = vmatmul.mubr.bf16.vlgmr.msra.gmra.mrb[16].mxu0 %v3145_v37 }
 0x306   :  { %v555_v48 = vpop.xlane.xlu1 %554  ;;  %v613_v50 = vmax.f32 %v597_v38, 0.0  ;;  %v598_v1 = vmul.f32 %v2610_v39, %v3082_v4 }
 0x307   :  { %v2612_v51 = vpop.eup %2611  ;;  %2621 = vrsqrt.f32 %v572_v40  ;;  %v573_v53 = vmax.f32 %v555_v48, 1e-24 }
 0x308   :  { %v557_v55 = vpop.xlane.xlu0 %556  ;;  %v3151_v57 = vpack.c.bf16 %v613_v50, %v612_v49  ;;  %v599_v58 = vmul.f32 %v2612_v51, %v3090_v7  ;;  %v614_v62 = vmax.f32 %v598_v1, 0.0 }
 0x309   :  { %v2614_v60 = vpop.eup %2613  ;;  %2623 = vrsqrt.f32 %v573_v53  ;;  %v574_v5 = vmax.f32 %v557_v55, 1e-24 }
 0x30a   :  { %v559_v61 = vpop.xlane.xlu1 %558  ;;  %2270 = vmatprep.mubr.bf16.mxu0 %v3151_v57  ;;  %v615_v63 = vmax.f32 %v599_v58, 0.0  ;;  %v600_v0 = vmul.f32 %v2614_v60, %v3097_v12 }
 0x30b   :  { %v2616_v2 = vpop.eup %2615  ;;  %2625 = vrsqrt.f32 %v574_v5  ;;  %v575_v4 = vmax.f32 %v559_v61, 1e-24 }
 0x30c   :  { %v3156_v3 = vpack.c.bf16 %v615_v63, %v614_v62  ;;  %v601_v6 = vmul.f32 %v2616_v2, %v3105_v18  ;;  %v616_v7 = vmax.f32 %v600_v0, 0.0  ;;  %v2565_v63 = vld [vmem:[#allocation11 + $0x40] sm:$0xff]   ;;  %v2567_v2 = vld [vmem:[#allocation11 + $0x48] sm:$0xff]  }
 0x30d   :  { %v2618_v8 = vpop.eup %2617  ;;  %2627 = vrsqrt.f32 %v575_v4  ;;  %v2566_v0 = vld [vmem:[#allocation10] sm:$0xff]   ;;  %v2568_v4 = vld [vmem:[#allocation10 + $0x8] sm:$0xff]   ;;  %2314 = vmatprep.subr.bf16.mxu0 %v2565_v63 }
 0x30e   :  { %2271 = vmatmul.mubr.bf16.gmra.mrb[20].mxu0 %v3156_v3  ;;  %v617_v9 = vmax.f32 %v601_v6, 0.0  ;;  %v602_v10 = vmul.f32 %v2618_v8, %v3102_v17 }
 0x30f   :  { %v2620_v11 = vpop.eup %2619  ;;  %2315 = vmatpush3.bf16.msra.mxu0 %v2565_v63 }
 0x310   :  { %v3161_v13 = vpack.c.bf16 %v617_v9, %v616_v7  ;;  %v603_v12 = vmul.f32 %v2620_v11, %v3110_v20  ;;  %v618_v15 = vmax.f32 %v602_v10, 0.0  ;;  %2316 = vmatprep.subr.bf16.mxu0 %v2567_v2 }
 0x311   :  { %v2622_v14 = vpop.eup %2621 }
 0x312   :  { %2274 = vmatprep.mubr.bf16.mxu0 %v3161_v13  ;;  %v619_v16 = vmax.f32 %v603_v12, 0.0  ;;  %v604_v18 = vmul.f32 %v2622_v14, %v3117_v26 }
 0x313   :  { %v2624_v19 = vpop.eup %2623  ;;  %2317 = vmatpush3.bf16.msra.mxu0 %v2567_v2  ;;  %v2576_v2 = vld [vmem:[#allocation10 + $0x28] sm:$0xff]  }
 0x314   :  { %v3166_v21 = vpack.c.bf16 %v619_v16, %v618_v15  ;;  %v605_v22 = vmul.f32 %v2624_v19, %v3125_v32  ;;  %v620_v17 = vmax.f32 %v604_v18, 0.0 }
 0x315   :  { %v2626_v23 = vpop.eup %2625 }
 0x316   :  { %2275 = vmatmul.mubr.bf16.gmra.mrb[24].mxu0 %v3166_v21  ;;  %v621_v24 = vmax.f32 %v605_v22, 0.0  ;;  %v606_v25 = vmul.f32 %v2626_v23, %v3122_v31 }
 0x317   :  { %v2628_v20 = vpop.eup %2627 }
 0x318   :  { %v3171_v27 = vpack.c.bf16 %v621_v24, %v620_v17  ;;  %v607_v28 = vmul.f32 %v2628_v20, %v3130_v34  ;;  %v622_v26 = vmax.f32 %v606_v25, 0.0 }
 0x31a   :  { %2278 = vmatprep.mubr.bf16.mxu0 %v3171_v27  ;;  %v623_v29 = vmax.f32 %v607_v28, 0.0 }
 0x31c   :  { %v3175_v30 = vpack.c.bf16 %v623_v29, %v622_v26 }
 0x31e   :  { %2279 = vmatmul.mubr.bf16.gmra.mrb[28].mxu0 %v3175_v30 }
 0x3d8   :  { %v2268_v32 = vpop.f32.mrb[16].mxu0 }
 0x3d9   :  { %v747_v54 = vpop.f32.mrb[17].mxu0 }
 0x3da   :  { %v2269_v33 = vpop.f32.mrb[18].mxu0 }
 0x3db   :  { %v811_v52 = vpack.c.bf16 %v2269_v33, %v2268_v32  ;;  %v750_v56 = vpop.f32.mrb[19].mxu0  ;;  %v2569_v33 = vld [vmem:[#allocation11 + $0x50] sm:$0xff]  }
 0x3dc   :  { %v810_v36 = vpack.c.bf16 %v750_v56, %v747_v54  ;;  %2318 = vmatprep.subr.bf16.mxu0 %v2569_v33 }
 0x3dd   :  { %2319 = vmatpush3.bf16.msra.mxu0 %v2569_v33 }
 0x3de   :  { %2282 = vmatprep.subr.bf16.mxu1 %v810_v36 }
 0x3df   :  { %2283 = vmatpush3.bf16.msra.mxu1 %v810_v36 }
 0x3e0   :  { %2284 = vmatprep.subr.bf16.mxu1 %v811_v52 }
 0x3e1   :  { %v2272_v31 = vpop.f32.mrb[20].mxu0 }
 0x3e2   :  { %v763_v59 = vpop.f32.mrb[21].mxu0 }
 0x3e3   :  { %v2273_v34 = vpop.f32.mrb[22].mxu0  ;;  %2285 = vmatpush3.bf16.msra.mxu1 %v811_v52  ;;  %v2570_v52 = vld [vmem:[#allocation10 + $0x10] sm:$0xff]  }
 0x3e4   :  { %v813_v38 = vpack.c.bf16 %v2273_v34, %v2272_v31  ;;  %v766_v39 = vpop.f32.mrb[23].mxu0 }
 0x3e5   :  { %v812_v40 = vpack.c.bf16 %v766_v39, %v763_v59  ;;  %v2572_v39 = vld [vmem:[#allocation10 + $0x18] sm:$0xff]  }
 0x3e7   :  { %2286 = vmatprep.subr.bf16.mxu1 %v812_v40 }
 0x3e8   :  { %2287 = vmatpush3.bf16.msra.mxu1 %v812_v40 }
 0x3e9   :  { %v2276_v48 = vpop.f32.mrb[24].mxu0  ;;  %2288 = vmatprep.subr.bf16.mxu1 %v813_v38 }
 0x3ea   :  { %v779_v49 = vpop.f32.mrb[25].mxu0 }
 0x3eb   :  { %v2277_v50 = vpop.f32.mrb[26].mxu0 }
 0x3ec   :  { %v815_v1 = vpack.c.bf16 %v2277_v50, %v2276_v48  ;;  %v782_v51 = vpop.f32.mrb[27].mxu0  ;;  %2289 = vmatpush3.bf16.msra.mxu1 %v813_v38  ;;  %v2571_v38 = vld [vmem:[#allocation11 + $0x58] sm:$0xff]  }
 0x3ed   :  { %v814_v53 = vpack.c.bf16 %v782_v51, %v779_v49  ;;  %2320 = vmatprep.subr.bf16.mxu0 %v2571_v38 }
 0x3ee   :  { %2321 = vmatpush3.bf16.msra.mxu0 %v2571_v38 }
 0x3ef   :  { %2290 = vmatprep.subr.bf16.mxu1 %v814_v53 }
 0x3f0   :  { %2291 = vmatpush3.bf16.msra.mxu1 %v814_v53 }
 0x3f1   :  { %v2280_v55 = vpop.f32.mrb[28].mxu0  ;;  %2292 = vmatprep.subr.bf16.mxu1 %v815_v1 }
 0x3f2   :  { %v795_v58 = vpop.f32.mrb[29].mxu0 }
 0x3f3   :  { %v2281_v60 = vpop.f32.mrb[30].mxu0 }
 0x3f4   :  { %v817_v5 = vpack.c.bf16 %v2281_v60, %v2280_v55  ;;  %v798_v61 = vpop.f32.mrb[31].mxu0  ;;  %2293 = vmatpush3.bf16.msra.mxu1 %v815_v1  ;;  %v2573_v55 = vld [vmem:[#allocation11 + $0x60] sm:$0xff]  }
 0x3f5   :  { %v816_v62 = vpack.c.bf16 %v798_v61, %v795_v58  ;;  %v2574_v58 = vld [vmem:[#allocation10 + $0x20] sm:$0xff]   ;;  %2322 = vmatprep.subr.bf16.mxu0 %v2573_v55 }
 0x3f6   :  { %2323 = vmatpush3.bf16.msra.mxu0 %v2573_v55 }
 0x3f7   :  { %2294 = vmatprep.subr.bf16.mxu1 %v816_v62 }
 0x3f8   :  { %2295 = vmatpush3.bf16.msra.mxu1 %v816_v62 }
 0x3f9   :  { %2296 = vmatprep.subr.bf16.mxu1 %v817_v5 }
 0x3fc   :  { %2297 = vmatpush3.bf16.msra.mxu1 %v817_v5 }
 0x3fd   :  { %2378 = vmatprep.subr.bf16.mxu1 %v2566_v0 }
 0x3ff   :  { %2299 = vmatmul.mubr.bf16.vlgmr.msra.gmra.mrb[16].mxu1 %v3032_v41  ;;  %v3188_v41 = vld [vmem:[%s3443_s5 + $0x1] ss:$0 sm:$0xff] }
 0x400   :  { %2302 = vmatprep.mubr.bf16.mxu1 %v3034_v42  ;;  %2379 = vmatpush3.bf16.msra.mxu1 %v2566_v0  ;;  %v2575_v0 = vld [vmem:[#allocation11 + $0x68] sm:$0xff]  }
 0x401   :  { %2380 = vmatprep.subr.bf16.mxu1 %v2568_v4  ;;  %2324 = vmatprep.subr.bf16.mxu0 %v2575_v0 }
 0x402   :  { %2325 = vmatpush3.bf16.msra.mxu0 %v2575_v0 }
 0x404   :  { %2381 = vmatpush3.bf16.msra.mxu1 %v2568_v4 }
 0x405   :  { %2382 = vmatprep.subr.bf16.mxu1 %v2570_v52 }
 0x407   :  { %2303 = vmatmul.mubr.bf16.gmra.mrb[20].mxu1 %v3038_v43 }
 0x408   :  { %2306 = vmatprep.mubr.bf16.mxu1 %v3040_v44  ;;  %2383 = vmatpush3.bf16.msra.mxu1 %v2570_v52 }
 0x409   :  { %2384 = vmatprep.subr.bf16.mxu1 %v2572_v39 }
 0x40c   :  { %2385 = vmatpush3.bf16.msra.mxu1 %v2572_v39 }
 0x40d   :  { %2386 = vmatprep.subr.bf16.mxu1 %v2574_v58 }
 0x40f   :  { %2307 = vmatmul.mubr.bf16.gmra.mrb[24].mxu1 %v3044_v45 }
 0x410   :  { %2310 = vmatprep.mubr.bf16.mxu1 %v3046_v46  ;;  %2387 = vmatpush3.bf16.msra.mxu1 %v2574_v58 }
 0x411   :  { %2388 = vmatprep.subr.bf16.mxu1 %v2576_v2 }
 0x414   :  { %2389 = vmatpush3.bf16.msra.mxu1 %v2576_v2 }
 0x417   :  { %2311 = vmatmul.mubr.bf16.gmra.mrb[28].mxu1 %v3050_v47 }
 0x4d2   :  { %v2300_v42 = vpop.f32.mrb[16].mxu1 }
 0x4d3   :  { %v856_v43 = vpop.f32.mrb[17].mxu1  ;;  %v3194_v47 = vadd.f32 %v2300_v42, %v3188_v41 }
 0x4d4   :  { %v3191_v44 = vadd.f32 %v3188_v41, %v856_v43  ;;  %v2301_v45 = vpop.f32.mrb[18].mxu1  ;;  %v2578_v43 = vld [vmem:[#allocation10 + $0x30] sm:$0xff]  }
 0x4d5   :  { %v859_v46 = vpop.f32.mrb[19].mxu1  ;;  %v3202_v7 = vadd.f32 %v2301_v45, %v3188_v41  ;;  %v921_v11 = vmul.f32 %v3194_v47, %v3194_v47  ;;  %2390 = vmatprep.subr.bf16.mxu1 %v2578_v43  ;;  %v2579_v45 = vld [vmem:[#allocation11 + $0x78] sm:$0xff]  }
 0x4d6   :  { %v3197_v6 = vadd.f32 %v3188_v41, %v859_v46  ;;  %v919_v8 = vmul.f32 %v3191_v44, %v3191_v44  ;;  %2391 = vmatpush3.bf16.msra.mxu1 %v2578_v43  ;;  %v2580_v46 = vld [vmem:[#allocation10 + $0x38] sm:$0xff]  }
 0x4d7   :  { %v922_v16 = vmul.f32 %v3202_v7, %v3202_v7  ;;  %2392 = vmatprep.subr.bf16.mxu1 %v2580_v46 }
 0x4d8   :  { %935 = vadd.xlane.f32.xlu0 %v919_v8  ;;  %v920_v9 = vmul.f32 %v3197_v6, %v3197_v6  ;;  %v3270_v8 = vld [vmem:[#allocation11] sm:$0xff]  }
 0x4da   :  { %v2304_v10 = vpop.f32.mrb[20].mxu1  ;;  %937 = vadd.xlane.f32.xlu1 %v920_v9  ;;  %2393 = vmatpush3.bf16.msra.mxu1 %v2580_v46 }
 0x4db   :  { %v872_v12 = vpop.f32.mrb[21].mxu1  ;;  %v3214_v19 = vadd.f32 %v2304_v10, %v3188_v41 }
 0x4dc   :  { %v3209_v14 = vadd.f32 %v3188_v41, %v872_v12  ;;  %v2305_v15 = vpop.f32.mrb[22].mxu1  ;;  %939 = vadd.xlane.f32.xlu0 %v921_v11 }
 0x4dd   :  { %v875_v18 = vpop.f32.mrb[23].mxu1  ;;  %v3222_v17 = vadd.f32 %v2305_v15, %v3188_v41  ;;  %v925_v20 = vmul.f32 %v3214_v19, %v3214_v19 }
 0x4de   :  { %v3217_v22 = vadd.f32 %v3188_v41, %v875_v18  ;;  %941 = vadd.xlane.f32.xlu1 %v922_v16  ;;  %v923_v23 = vmul.f32 %v3209_v14, %v3209_v14 }
 0x4df   :  { %v926_v32 = vmul.f32 %v3222_v17, %v3222_v17 }
 0x4e0   :  { %943 = vadd.xlane.f32.xlu0 %v923_v23  ;;  %v924_v24 = vmul.f32 %v3217_v22, %v3217_v22 }
 0x4e2   :  { %v2308_v25 = vpop.f32.mrb[24].mxu1  ;;  %945 = vadd.xlane.f32.xlu1 %v924_v24 }
 0x4e3   :  { %v888_v28 = vpop.f32.mrb[25].mxu1  ;;  %v3234_v56 = vadd.f32 %v2308_v25, %v3188_v41 }
 0x4e4   :  { %v3229_v26 = vadd.f32 %v3188_v41, %v888_v28  ;;  %v2309_v29 = vpop.f32.mrb[26].mxu1  ;;  %947 = vadd.xlane.f32.xlu0 %v925_v20 }
 0x4e5   :  { %v891_v54 = vpop.f32.mrb[27].mxu1  ;;  %v3242_v59 = vadd.f32 %v2309_v29, %v3188_v41  ;;  %v929_v48 = vmul.f32 %v3234_v56, %v3234_v56 }
 0x4e6   :  { %v3237_v36 = vadd.f32 %v3188_v41, %v891_v54  ;;  %949 = vadd.xlane.f32.xlu1 %v926_v32  ;;  %v927_v31 = vmul.f32 %v3229_v26, %v3229_v26 }
 0x4e7   :  { %v930_v51 = vmul.f32 %v3242_v59, %v3242_v59 }
 0x4e8   :  { %951 = vadd.xlane.f32.xlu0 %v927_v31  ;;  %v928_v34 = vmul.f32 %v3237_v36, %v3237_v36 }
 0x4ea   :  { %v2312_v40 = vpop.f32.mrb[28].mxu1  ;;  %953 = vadd.xlane.f32.xlu1 %v928_v34 }
 0x4eb   :  { %v904_v49 = vpop.f32.mrb[29].mxu1  ;;  %v3254_v60 = vadd.f32 %v2312_v40, %v3188_v41 }
 0x4ec   :  { %v3249_v50 = vadd.f32 %v3188_v41, %v904_v49  ;;  %v2313_v1 = vpop.f32.mrb[30].mxu1  ;;  %955 = vadd.xlane.f32.xlu0 %v929_v48 }
 0x4ed   :  { %v907_v53 = vpop.f32.mrb[31].mxu1  ;;  %v3262_v62 = vadd.f32 %v2313_v1, %v3188_v41  ;;  %v933_v4 = vmul.f32 %v3254_v60, %v3254_v60 }
 0x4ee   :  { %v3257_v5 = vadd.f32 %v3188_v41, %v907_v53  ;;  %957 = vadd.xlane.f32.xlu1 %v930_v51  ;;  %v931_v61 = vmul.f32 %v3249_v50, %v3249_v50  ;;  %v2577_v41 = vld [vmem:[#allocation11 + $0x70] sm:$0xff]  }
 0x4ef   :  { %v934_v42 = vmul.f32 %v3262_v62, %v3262_v62  ;;  %2326 = vmatprep.subr.bf16.mxu0 %v2577_v41 }
 0x4f0   :  { %959 = vadd.xlane.f32.xlu0 %v931_v61  ;;  %v932_v63 = vmul.f32 %v3257_v5, %v3257_v5  ;;  %2327 = vmatpush3.bf16.msra.mxu0 %v2577_v41 }
 0x4f1   :  { %2328 = vmatprep.subr.bf16.mxu0 %v2579_v45 }
 0x4f2   :  { %961 = vadd.xlane.f32.xlu1 %v932_v63 }
 0x4f4   :  { %963 = vadd.xlane.f32.xlu0 %v933_v4  ;;  %2329 = vmatpush3.bf16.msra.mxu0 %v2579_v45 }
 0x4f5   :  { %2346 = vmatprep.subr.bf16.mxu0 %v3270_v8 }
 0x4f6   :  { %965 = vadd.xlane.f32.xlu1 %v934_v42 }
 0x565   :  { %v936_v9 = vpop.xlane.xlu0 %935 }
 0x566   :  { %v967_v10 = vmax.f32 %v936_v9, 1e-24 }
 0x567   :  { %v938_v11 = vpop.xlane.xlu1 %937 }
 0x568   :  { %2629 = vrsqrt.f32 %v967_v10  ;;  %v968_v12 = vmax.f32 %v938_v11, 1e-24 }
 0x569   :  { %v940_v15 = vpop.xlane.xlu0 %939 }
 0x56a   :  { %2631 = vrsqrt.f32 %v968_v12  ;;  %v969_v16 = vmax.f32 %v940_v15, 1e-24 }
 0x56b   :  { %v942_v18 = vpop.xlane.xlu1 %941 }
 0x56c   :  { %2633 = vrsqrt.f32 %v969_v16  ;;  %v970_v23 = vmax.f32 %v942_v18, 1e-24 }
 0x56d   :  { %v944_v24 = vpop.xlane.xlu0 %943 }
 0x56e   :  { %2635 = vrsqrt.f32 %v970_v23  ;;  %v971_v25 = vmax.f32 %v944_v24, 1e-24 }
 0x56f   :  { %v946_v20 = vpop.xlane.xlu1 %945 }
 0x570   :  { %2637 = vrsqrt.f32 %v971_v25  ;;  %v972_v28 = vmax.f32 %v946_v20, 1e-24  ;;  %v2583_v20 = vld [vmem:[#allocation11 + $0x10] sm:$0xff]  }
 0x571   :  { %v948_v29 = vpop.xlane.xlu0 %947 }
 0x572   :  { %v2630_v32 = vpop.eup %2629  ;;  %2639 = vrsqrt.f32 %v972_v28  ;;  %v973_v54 = vmax.f32 %v948_v29, 1e-24 }
 0x573   :  { %v950_v33 = vpop.xlane.xlu1 %949  ;;  %v999_v52 = vmul.f32 %v2630_v32, %v3191_v44 }
 0x574   :  { %v2632_v31 = vpop.eup %2631  ;;  %2641 = vrsqrt.f32 %v973_v54  ;;  %v974_v34 = vmax.f32 %v950_v33, 1e-24 }
 0x575   :  { %v952_v38 = vpop.xlane.xlu0 %951  ;;  %v1000_v39 = vmul.f32 %v2632_v31, %v3197_v6  ;;  %v1015_v51 = vmax.f32 %v999_v52, 0.0 }
 0x576   :  { %v2634_v40 = vpop.eup %2633  ;;  %2643 = vrsqrt.f32 %v974_v34  ;;  %v975_v48 = vmax.f32 %v952_v38, 1e-24 }
 0x577   :  { %v1001_v49 = vmul.f32 %v2634_v40, %v3194_v47  ;;  %v954_v1 = vpop.xlane.xlu1 %953  ;;  %v1016_v53 = vmax.f32 %v1000_v39, 0.0 }
 0x578   :  { %v2636_v55 = vpop.eup %2635  ;;  %2645 = vrsqrt.f32 %v975_v48  ;;  %v976_v58 = vmax.f32 %v954_v1, 1e-24 }
 0x579   :  { %v1002_v61 = vmul.f32 %v2636_v55, %v3202_v7  ;;  %v956_v44 = vpop.xlane.xlu0 %955  ;;  %v1031_v63 = vpack.c.bf16 %v1016_v53, %v1015_v51  ;;  %v1017_v4 = vmax.f32 %v1001_v49, 0.0  ;;  %v2582_v7 = vld [vmem:[#allocation11 + $0x8] sm:$0xff]   ;;  %v2585_v51 = vld [vmem:[#allocation11 + $0x20] sm:$0xff]  }
 0x57a   :  { %v2638_v0 = vpop.eup %2637  ;;  %2647 = vrsqrt.f32 %v976_v58  ;;  %v977_v2 = vmax.f32 %v956_v44, 1e-24 }
 0x57b   :  { %v1018_v6 = vmax.f32 %v1002_v61, 0.0  ;;  %v958_v42 = vpop.xlane.xlu1 %957  ;;  %2330 = vmatprep.mubr.bf16.mxu0 %v1031_v63  ;;  %2394 = vmatprep.mubr.bf16.mxu1 %v1031_v63  ;;  %v1003_v47 = vmul.f32 %v2638_v0, %v3209_v14  ;;  %v2586_v63 = vld [vmem:[#allocation11 + $0x28] sm:$0xff]  }
 0x57c   :  { %v2640_v41 = vpop.eup %2639  ;;  %2649 = vrsqrt.f32 %v977_v2  ;;  %v978_v43 = vmax.f32 %v958_v42, 1e-24 }
 0x57d   :  { %v960_v45 = vpop.xlane.xlu0 %959  ;;  %v1032_v46 = vpack.c.bf16 %v1018_v6, %v1017_v4  ;;  %v1004_v9 = vmul.f32 %v2640_v41, %v3217_v22  ;;  %v1019_v15 = vmax.f32 %v1003_v47, 0.0  ;;  %v2587_v47 = vld [vmem:[#allocation11 + $0x30] sm:$0xff]  }
 0x57e   :  { %v2642_v10 = vpop.eup %2641  ;;  %2651 = vrsqrt.f32 %v978_v43  ;;  %v979_v11 = vmax.f32 %v960_v45, 1e-24  ;;  %v2588_v45 = vld [vmem:[#allocation11 + $0x38] sm:$0xff]  }
 0x57f   :  { %v962_v12 = vpop.xlane.xlu1 %961  ;;  %2331 = vmatmul.mubr.bf16.vlgmr.msra.gmra.mrb[32].mxu0 %v1032_v46  ;;  %2395 = vmatmul.mubr.bf16.vlgmr.msra.gmra.mrb[32].mxu1 %v1032_v46  ;;  %v1020_v16 = vmax.f32 %v1004_v9, 0.0  ;;  %v1005_v18 = vmul.f32 %v2642_v10, %v3214_v19 }
 0x580   :  { %v2644_v23 = vpop.eup %2643  ;;  %2653 = vrsqrt.f32 %v979_v11  ;;  %v980_v14 = vmax.f32 %v962_v12, 1e-24  ;;  %2347 = vmatpush3.bf16.msra.mxu0 %v3270_v8 }
 0x581   :  { %v964_v24 = vpop.xlane.xlu0 %963  ;;  %v1033_v25 = vpack.c.bf16 %v1020_v16, %v1019_v15  ;;  %2348 = vmatprep.subr.bf16.mxu0 %v2582_v7  ;;  %v1006_v22 = vmul.f32 %v2644_v23, %v3222_v17  ;;  %v1021_v54 = vmax.f32 %v1005_v18, 0.0  ;;  %v2584_v17 = vld [vmem:[#allocation11 + $0x18] sm:$0xff]  }
 0x582   :  { %v2646_v28 = vpop.eup %2645  ;;  %2655 = vrsqrt.f32 %v980_v14  ;;  %v981_v29 = vmax.f32 %v964_v24, 1e-24 }
 0x583   :  { %v966_v32 = vpop.xlane.xlu1 %965  ;;  %2334 = vmatprep.mubr.bf16.mxu0 %v1033_v25  ;;  %2398 = vmatprep.mubr.bf16.mxu1 %v1033_v25  ;;  %v1022_v33 = vmax.f32 %v1006_v22, 0.0  ;;  %v1007_v19 = vmul.f32 %v2646_v28, %v3229_v26  ;;  %v2694_v28 = vld [vmem:[#allocation5 + $0x8] sm:$0xff]  }
 0x584   :  { %v2648_v52 = vpop.eup %2647  ;;  %2657 = vrsqrt.f32 %v981_v29  ;;  %v982_v31 = vmax.f32 %v966_v32, 1e-24  ;;  %2349 = vmatpush3.bf16.msra.mxu0 %v2582_v7  ;;  %v2695_v29 = vld [vmem:[#allocation5 + $0x10] sm:$0xff]   ;;  %v2696_v32 = vld [vmem:[#allocation5 + $0x18] sm:$0xff]  }
 0x585   :  { %v1034_v8 = vpack.c.bf16 %v1022_v33, %v1021_v54  ;;  %2350 = vmatprep.subr.bf16.mxu0 %v2583_v20  ;;  %v1008_v34 = vmul.f32 %v2648_v52, %v3237_v36  ;;  %v1023_v39 = vmax.f32 %v1007_v19, 0.0  ;;  %v2697_v54 = vld [vmem:[#allocation5 + $0x20] sm:$0xff]  }
 0x586   :  { %v2650_v38 = vpop.eup %2649  ;;  %2659 = vrsqrt.f32 %v982_v31 }
 0x587   :  { %2335 = vmatmul.mubr.bf16.gmra.mrb[36].mxu0 %v1034_v8  ;;  %2399 = vmatmul.mubr.bf16.gmra.mrb[36].mxu1 %v1034_v8  ;;  %v1024_v40 = vmax.f32 %v1008_v34, 0.0  ;;  %v1009_v48 = vmul.f32 %v2650_v38, %v3234_v56  ;;  %v2698_v8 = vld [vmem:[#allocation5 + $0x28] sm:$0xff]   ;;  %v2699_v34 = vld [vmem:[#allocation5 + $0x30] sm:$0xff]  }
 0x588   :  { %v2652_v49 = vpop.eup %2651  ;;  %2351 = vmatpush3.bf16.msra.mxu0 %v2583_v20 }
 0x589   :  { %v1035_v26 = vpack.c.bf16 %v1024_v40, %v1023_v39  ;;  %2352 = vmatprep.subr.bf16.mxu0 %v2584_v17  ;;  %v1010_v1 = vmul.f32 %v2652_v49, %v3242_v59  ;;  %v1025_v36 = vmax.f32 %v1009_v48, 0.0  ;;  %v2700_v48 = vld [vmem:[#allocation5 + $0x38] sm:$0xff]   ;;  %v2589_v49 = vld [vmem:[#allocation11 + $0x80] sm:$0xff]  }
 0x58a   :  { %v2654_v53 = vpop.eup %2653 }
 0x58b   :  { %2338 = vmatprep.mubr.bf16.mxu0 %v1035_v26  ;;  %2402 = vmatprep.mubr.bf16.mxu1 %v1035_v26  ;;  %v1026_v55 = vmax.f32 %v1010_v1, 0.0  ;;  %v1011_v58 = vmul.f32 %v2654_v53, %v3249_v50  ;;  %v2590_v26 = vld [vmem:[#allocation11 + $0x88] sm:$0xff]   ;;  %v3317_v1 = vld [vmem:[%s3443_s5 + $0x2] ss:$0 sm:$0xff] }
 0x58c   :  { %v2656_v61 = vpop.eup %2655  ;;  %2353 = vmatpush3.bf16.msra.mxu0 %v2584_v17 }
 0x58d   :  { %v1036_v44 = vpack.c.bf16 %v1026_v55, %v1025_v36  ;;  %2354 = vmatprep.subr.bf16.mxu0 %v2585_v51  ;;  %v1012_v56 = vmul.f32 %v2656_v61, %v3257_v5  ;;  %v1027_v2 = vmax.f32 %v1011_v58, 0.0 }
 0x58e   :  { %v2658_v0 = vpop.eup %2657 }
 0x58f   :  { %2339 = vmatmul.mubr.bf16.gmra.mrb[40].mxu0 %v1036_v44  ;;  %2403 = vmatmul.mubr.bf16.gmra.mrb[40].mxu1 %v1036_v44  ;;  %v1028_v59 = vmax.f32 %v1012_v56, 0.0  ;;  %v1013_v4 = vmul.f32 %v2658_v0, %v3254_v60  ;;  %v2693_v60 = vld [vmem:[#allocation5] sm:$0xff]  }
 0x590   :  { %v2660_v6 = vpop.eup %2659  ;;  %2355 = vmatpush3.bf16.msra.mxu0 %v2585_v51 }
 0x591   :  { %v1037_v42 = vpack.c.bf16 %v1028_v59, %v1027_v2  ;;  %2356 = vmatprep.subr.bf16.mxu0 %v2586_v63  ;;  %v1014_v50 = vmul.f32 %v2660_v6, %v3262_v62  ;;  %v1029_v41 = vmax.f32 %v1013_v4, 0.0 }
 0x593   :  { %2342 = vmatprep.mubr.bf16.mxu0 %v1037_v42  ;;  %2406 = vmatprep.mubr.bf16.mxu1 %v1037_v42  ;;  %v1030_v43 = vmax.f32 %v1014_v50, 0.0 }
 0x594   :  { %2357 = vmatpush3.bf16.msra.mxu0 %v2586_v63 }
 0x595   :  { %v1038_v5 = vpack.c.bf16 %v1030_v43, %v1029_v41  ;;  %2358 = vmatprep.subr.bf16.mxu0 %v2587_v47 }
 0x597   :  { %2343 = vmatmul.mubr.bf16.gmra.mrb[44].mxu0 %v1038_v5  ;;  %2407 = vmatmul.mubr.bf16.gmra.mrb[44].mxu1 %v1038_v5 }
 0x598   :  { %2359 = vmatpush3.bf16.msra.mxu0 %v2587_v47  ;;  %2362 = vmatprep.mubr.bf16.mxu0 %v3142_v35 }
 0x599   :  { %2360 = vmatprep.subr.bf16.mxu0 %v2588_v45  ;;  %2426 = vmatprep.mubr.bf16.mxu1 %v2693_v60 }
 0x59c   :  { %2361 = vmatpush3.bf16.msra.mxu0 %v2588_v45 }
 0x59d   :  { %2442 = vmatprep.subr.bf16.mxu0 %v2589_v49 }
 0x59f   :  { %2363 = vmatmul.mubr.bf16.vlgmr.msra.gmra.mrb[32].mxu0 %v3145_v37 }
 0x5a0   :  { %2366 = vmatprep.mubr.bf16.mxu0 %v3151_v57  ;;  %2443 = vmatpush3.bf16.msra.mxu0 %v2589_v49 }
 0x5a1   :  { %2444 = vmatprep.subr.bf16.mxu0 %v2590_v26 }
 0x5a4   :  { %2445 = vmatpush3.bf16.msra.mxu0 %v2590_v26 }
 0x5a7   :  { %2367 = vmatmul.mubr.bf16.gmra.mrb[36].mxu0 %v3156_v3 }
 0x5a8   :  { %2370 = vmatprep.mubr.bf16.mxu0 %v3161_v13 }
 0x5af   :  { %2371 = vmatmul.mubr.bf16.gmra.mrb[40].mxu0 %v3166_v21 }
 0x5b0   :  { %2374 = vmatprep.mubr.bf16.mxu0 %v3171_v27 }
 0x5b7   :  { %2375 = vmatmul.mubr.bf16.gmra.mrb[44].mxu0 %v3175_v30 }
 0x652   :  { %v2396_v62 = vpop.f32.mrb[32].mxu1 }
 0x653   :  { %v1445_v35 = vpop.f32.mrb[33].mxu1 }
 0x654   :  { %v2397_v46 = vpop.f32.mrb[34].mxu1 }
 0x655   :  { %v1509_v9 = vpack.c.bf16 %v2397_v46, %v2396_v62  ;;  %v1448_v7 = vpop.f32.mrb[35].mxu1 }
 0x656   :  { %v1508_v10 = vpack.c.bf16 %v1448_v7, %v1445_v35 }
 0x658   :  { %2410 = vmatprep.subr.bf16.mxu1 %v1508_v10 }
 0x659   :  { %2411 = vmatpush3.bf16.msra.mxu1 %v1508_v10 }
 0x65a   :  { %v2400_v37 = vpop.f32.mrb[36].mxu1  ;;  %2412 = vmatprep.subr.bf16.mxu1 %v1509_v9 }
 0x65b   :  { %v1461_v57 = vpop.f32.mrb[37].mxu1 }
 0x65c   :  { %v2401_v3 = vpop.f32.mrb[38].mxu1 }
 0x65d   :  { %v1511_v11 = vpack.c.bf16 %v2401_v3, %v2400_v37  ;;  %v1464_v13 = vpop.f32.mrb[39].mxu1  ;;  %2413 = vmatpush3.bf16.msra.mxu1 %v1509_v9  ;;  %v2591_v37 = vld [vmem:[#allocation11 + $0x90] sm:$0xff]  }
 0x65e   :  { %v1510_v21 = vpack.c.bf16 %v1464_v13, %v1461_v57  ;;  %2446 = vmatprep.subr.bf16.mxu0 %v2591_v37  ;;  %v2592_v13 = vld [vmem:[#allocation11 + $0x98] sm:$0xff]  }
 0x65f   :  { %2447 = vmatpush3.bf16.msra.mxu0 %v2591_v37 }
 0x660   :  { %2414 = vmatprep.subr.bf16.mxu1 %v1510_v21  ;;  %2448 = vmatprep.subr.bf16.mxu0 %v2592_v13 }
 0x661   :  { %2415 = vmatpush3.bf16.msra.mxu1 %v1510_v21 }
 0x662   :  { %v2404_v27 = vpop.f32.mrb[40].mxu1  ;;  %2416 = vmatprep.subr.bf16.mxu1 %v1511_v11 }
 0x663   :  { %v1477_v30 = vpop.f32.mrb[41].mxu1  ;;  %2449 = vmatpush3.bf16.msra.mxu0 %v2592_v13 }
 0x664   :  { %v2405_v12 = vpop.f32.mrb[42].mxu1 }
 0x665   :  { %v1513_v15 = vpack.c.bf16 %v2405_v12, %v2404_v27  ;;  %v1480_v16 = vpop.f32.mrb[43].mxu1  ;;  %2417 = vmatpush3.bf16.msra.mxu1 %v1511_v11 }
 0x666   :  { %v1512_v18 = vpack.c.bf16 %v1480_v16, %v1477_v30 }
 0x668   :  { %2418 = vmatprep.subr.bf16.mxu1 %v1512_v18 }
 0x669   :  { %2419 = vmatpush3.bf16.msra.mxu1 %v1512_v18 }
 0x66a   :  { %v2408_v23 = vpop.f32.mrb[44].mxu1  ;;  %2420 = vmatprep.subr.bf16.mxu1 %v1513_v15 }
 0x66b   :  { %v1493_v14 = vpop.f32.mrb[45].mxu1 }
 0x66c   :  { %v2409_v24 = vpop.f32.mrb[46].mxu1 }
 0x66d   :  { %v1515_v25 = vpack.c.bf16 %v2409_v24, %v2408_v23  ;;  %v1496_v22 = vpop.f32.mrb[47].mxu1  ;;  %2421 = vmatpush3.bf16.msra.mxu1 %v1513_v15  ;;  %v2593_v24 = vld [vmem:[#allocation11 + $0xa0] sm:$0xff]  }
 0x66e   :  { %v1514_v20 = vpack.c.bf16 %v1496_v22, %v1493_v14  ;;  %2450 = vmatprep.subr.bf16.mxu0 %v2593_v24 }
 0x66f   :  { %2451 = vmatpush3.bf16.msra.mxu0 %v2593_v24 }
 0x670   :  { %2422 = vmatprep.subr.bf16.mxu1 %v1514_v20 }
 0x671   :  { %2423 = vmatpush3.bf16.msra.mxu1 %v1514_v20 }
 0x672   :  { %2424 = vmatprep.subr.bf16.mxu1 %v1515_v25 }
 0x675   :  { %2425 = vmatpush3.bf16.msra.mxu1 %v1515_v25 }
 0x676   :  { %2474 = vmatprep.subr.bf16.mxu1 %v2589_v49 }
 0x678   :  { %2427 = vmatmul.mubr.bf16.vlgmr.msra.gmra.mrb[48].mxu1 %v2694_v28 }
 0x679   :  { %2430 = vmatprep.mubr.bf16.mxu1 %v2695_v29  ;;  %2482 = vmatpush3.bf16.msra.mxu1 %v2589_v49  ;;  %v2594_v29 = vld [vmem:[#allocation11 + $0xa8] sm:$0xff]   ;;  %v2596_v49 = vld [vmem:[#allocation11 + $0xb8] sm:$0xff]  }
 0x67a   :  { %2475 = vmatprep.subr.bf16.mxu1 %v2590_v26  ;;  %2452 = vmatprep.subr.bf16.mxu0 %v2594_v29 }
 0x67b   :  { %2453 = vmatpush3.bf16.msra.mxu0 %v2594_v29 }
 0x67d   :  { %2483 = vmatpush3.bf16.msra.mxu1 %v2590_v26 }
 0x67e   :  { %2476 = vmatprep.subr.bf16.mxu1 %v2591_v37 }
 0x680   :  { %2431 = vmatmul.mubr.bf16.gmra.mrb[52].mxu1 %v2696_v32 }
 0x681   :  { %2434 = vmatprep.mubr.bf16.mxu1 %v2697_v54  ;;  %2484 = vmatpush3.bf16.msra.mxu1 %v2591_v37 }
 0x682   :  { %v3298_v33 = vpop.f32.mrb[40].mxu0  ;;  %2477 = vmatprep.subr.bf16.mxu1 %v2592_v13 }
 0x683   :  { %v3300_v19 = vpop.f32.mrb[41].mxu0 }
 0x684   :  { %v3302_v52 = vpop.f32.mrb[42].mxu0 }
 0x685   :  { %v3304_v31 = vpop.f32.mrb[43].mxu0  ;;  %2485 = vmatpush3.bf16.msra.mxu1 %v2592_v13 }
 0x686   :  { %2478 = vmatprep.subr.bf16.mxu1 %v2593_v24 }
 0x688   :  { %2435 = vmatmul.mubr.bf16.gmra.mrb[56].mxu1 %v2698_v8 }
 0x689   :  { %2438 = vmatprep.mubr.bf16.mxu1 %v2699_v34  ;;  %2486 = vmatpush3.bf16.msra.mxu1 %v2593_v24  ;;  %v2595_v34 = vld [vmem:[#allocation11 + $0xb0] sm:$0xff]  }
 0x68a   :  { %v3306_v17 = vpop.f32.mrb[44].mxu0  ;;  %2479 = vmatprep.subr.bf16.mxu1 %v2594_v29  ;;  %2454 = vmatprep.subr.bf16.mxu0 %v2595_v34 }
 0x68b   :  { %v3308_v38 = vpop.f32.mrb[45].mxu0  ;;  %2455 = vmatpush3.bf16.msra.mxu0 %v2595_v34 }
 0x68c   :  { %v3310_v39 = vpop.f32.mrb[46].mxu0  ;;  %2456 = vmatprep.subr.bf16.mxu0 %v2596_v49 }
 0x68d   :  { %v3312_v40 = vpop.f32.mrb[47].mxu0  ;;  %2487 = vmatpush3.bf16.msra.mxu1 %v2594_v29 }
 0x68e   :  { %2480 = vmatprep.subr.bf16.mxu1 %v2595_v34 }
 0x68f   :  { %2457 = vmatpush3.bf16.msra.mxu0 %v2596_v49 }
 0x690   :  { %2439 = vmatmul.mubr.bf16.gmra.mrb[60].mxu1 %v2700_v48 }
 0x691   :  { %2488 = vmatpush3.bf16.msra.mxu1 %v2595_v34 }
 0x692   :  { %2481 = vmatprep.subr.bf16.mxu1 %v2596_v49 }
 0x695   :  { %2489 = vmatpush3.bf16.msra.mxu1 %v2596_v49 }
 0x74b   :  { %v2428_v51 = vpop.f32.mrb[48].mxu1 }
 0x74c   :  { %v3320_v53 = vadd.f32 %v2428_v51, %v3317_v1  ;;  %v1554_v36 = vpop.f32.mrb[49].mxu1 }
 0x74d   :  { %v2429_v55 = vpop.f32.mrb[50].mxu1  ;;  %v3323_v58 = vadd.f32 %v3317_v1, %v1554_v36 }
 0x74e   :  { %v3326_v61 = vadd.f32 %v2429_v55, %v3317_v1  ;;  %v1557_v44 = vpop.f32.mrb[51].mxu1  ;;  %v1619_v56 = vmul.f32 %v3320_v53, %v3320_v53 }
 0x74f   :  { %v3331_v63 = vadd.f32 %v3317_v1, %v1557_v44  ;;  %v1617_v2 = vmul.f32 %v3323_v58, %v3323_v58 }
 0x750   :  { %1637 = vadd.xlane.f32.xlu0 %v1619_v56  ;;  %v1620_v0 = vmul.f32 %v3326_v61, %v3326_v61 }
 0x751   :  { %v1618_v6 = vmul.f32 %v3331_v63, %v3331_v63 }
 0x752   :  { %1639 = vadd.xlane.f32.xlu1 %v1620_v0 }
 0x753   :  { %v2432_v59 = vpop.f32.mrb[52].mxu1 }
 0x754   :  { %v1570_v4 = vpop.f32.mrb[53].mxu1  ;;  %1633 = vadd.xlane.f32.xlu0 %v1617_v2  ;;  %v3386_v20 = vadd.f32 %v2432_v59, %v3317_v1 }
 0x755   :  { %v3340_v42 = vadd.f32 %v3317_v1, %v1570_v4  ;;  %v2433_v50 = vpop.f32.mrb[54].mxu1 }
 0x756   :  { %v1573_v47 = vpop.f32.mrb[55].mxu1  ;;  %1635 = vadd.xlane.f32.xlu1 %v1618_v6  ;;  %v3391_v32 = vadd.f32 %v2433_v50, %v3317_v1  ;;  %v1623_v8 = vmul.f32 %v3386_v20, %v3386_v20 }
 0x757   :  { %v3343_v41 = vadd.f32 %v3317_v1, %v1573_v47  ;;  %v1621_v43 = vmul.f32 %v3340_v42, %v3340_v42 }
 0x758   :  { %v1624_v48 = vmul.f32 %v3391_v32, %v3391_v32 }
 0x759   :  { %1641 = vadd.xlane.f32.xlu0 %v1621_v43  ;;  %v1622_v5 = vmul.f32 %v3343_v41, %v3343_v41 }
 0x75b   :  { %v2436_v45 = vpop.f32.mrb[56].mxu1  ;;  %1643 = vadd.xlane.f32.xlu1 %v1622_v5 }
 0x75c   :  { %v3350_v60 = vadd.f32 %v2436_v45, %v3317_v1  ;;  %v1586_v62 = vpop.f32.mrb[57].mxu1 }
 0x75d   :  { %v2437_v35 = vpop.f32.mrb[58].mxu1  ;;  %v3353_v46 = vadd.f32 %v3317_v1, %v1586_v62 }
 0x75e   :  { %v3356_v9 = vadd.f32 %v2437_v35, %v3317_v1  ;;  %v1589_v7 = vpop.f32.mrb[59].mxu1  ;;  %v1627_v10 = vmul.f32 %v3350_v60, %v3350_v60 }
 0x75f   :  { %v3361_v57 = vadd.f32 %v3317_v1, %v1589_v7  ;;  %v1625_v11 = vmul.f32 %v3353_v46, %v3353_v46 }
 0x760   :  { %1653 = vadd.xlane.f32.xlu0 %v1627_v10  ;;  %v1628_v3 = vmul.f32 %v3356_v9, %v3356_v9 }
 0x761   :  { %v1626_v12 = vmul.f32 %v3361_v57, %v3361_v57 }
 0x762   :  { %1655 = vadd.xlane.f32.xlu1 %v1628_v3 }
 0x763   :  { %v2440_v21 = vpop.f32.mrb[60].mxu1 }
 0x764   :  { %v3368_v27 = vadd.f32 %v2440_v21, %v3317_v1  ;;  %v1602_v30 = vpop.f32.mrb[61].mxu1  ;;  %1649 = vadd.xlane.f32.xlu0 %v1625_v11 }
 0x765   :  { %v2441_v15 = vpop.f32.mrb[62].mxu1  ;;  %v3373_v16 = vadd.f32 %v3317_v1, %v1602_v30 }
 0x766   :  { %v3376_v18 = vadd.f32 %v2441_v15, %v3317_v1  ;;  %v1605_v23 = vpop.f32.mrb[63].mxu1  ;;  %1651 = vadd.xlane.f32.xlu1 %v1626_v12  ;;  %v1631_v14 = vmul.f32 %v3368_v27, %v3368_v27 }
 0x767   :  { %v3381_v25 = vadd.f32 %v3317_v1, %v1605_v23  ;;  %v1629_v28 = vmul.f32 %v3373_v16, %v3373_v16 }
 0x768   :  { %1661 = vadd.xlane.f32.xlu0 %v1631_v14  ;;  %v1632_v22 = vmul.f32 %v3376_v18, %v3376_v18 }
 0x769   :  { %v1630_v54 = vmul.f32 %v3381_v25, %v3381_v25 }
 0x76a   :  { %1663 = vadd.xlane.f32.xlu1 %v1632_v22 }
 0x76c   :  { %1657 = vadd.xlane.f32.xlu0 %v1629_v28 }
 0x76e   :  { %1659 = vadd.xlane.f32.xlu1 %v1630_v54 }
 0x770   :  { %1645 = vadd.xlane.f32.xlu0 %v1623_v8 }
 0x772   :  { %1647 = vadd.xlane.f32.xlu1 %v1624_v48 }
 0x7dd   :  { %v1638_v26 = vpop.xlane.xlu0 %1637 }
 0x7de   :  { %v1667_v1 = vmax.f32 %v1638_v26, 1e-24 }
 0x7df   :  { %v1640_v51 = vpop.xlane.xlu1 %1639 }
 0x7e0   :  { %v1668_v36 = vmax.f32 %v1640_v51, 1e-24 }
 0x7e1   :  { %v1634_v55 = vpop.xlane.xlu0 %1633 }
 0x7e2   :  { %2661 = vrsqrt.f32 %v1668_v36  ;;  %v1665_v44 = vmax.f32 %v1634_v55, 1e-24 }
 0x7e3   :  { %2663 = vrsqrt.f32 %v1667_v1  ;;  %v1636_v56 = vpop.xlane.xlu1 %1635 }
 0x7e4   :  { %2665 = vrsqrt.f32 %v1665_v44  ;;  %v1666_v0 = vmax.f32 %v1636_v56, 1e-24 }
 0x7e6   :  { %2667 = vrsqrt.f32 %v1666_v0  ;;  %v1642_v2 = vpop.xlane.xlu0 %1641 }
 0x7e7   :  { %v1669_v59 = vmax.f32 %v1642_v2, 1e-24 }
 0x7e8   :  { %v1644_v4 = vpop.xlane.xlu1 %1643 }
 0x7e9   :  { %2669 = vrsqrt.f32 %v1669_v59  ;;  %v1670_v6 = vmax.f32 %v1644_v4, 1e-24 }
 0x7eb   :  { %2671 = vrsqrt.f32 %v1670_v6 }
 0x7ec   :  { %v2662_v50 = vpop.eup %2661 }
 0x7ed   :  { %v2664_v47 = vpop.eup %2663  ;;  %v1654_v43 = vpop.xlane.xlu0 %1653  ;;  %v1700_v45 = vmul.f32 %v2662_v50, %v3326_v61 }
 0x7ee   :  { %v2666_v5 = vpop.eup %2665  ;;  %v1675_v62 = vmax.f32 %v1654_v43, 1e-24  ;;  %v1699_v37 = vmul.f32 %v2664_v47, %v3320_v53 }
 0x7ef   :  { %v1656_v35 = vpop.xlane.xlu1 %1655  ;;  %v1697_v7 = vmul.f32 %v2666_v5, %v3323_v58  ;;  %v1716_v21 = vmax.f32 %v1700_v45, 0.0 }
 0x7f0   :  { %v2668_v10 = vpop.eup %2667  ;;  %v1676_v3 = vmax.f32 %v1656_v35, 1e-24  ;;  %v1715_v61 = vmax.f32 %v1699_v37, 0.0 }
 0x7f1   :  { %v1650_v11 = vpop.xlane.xlu0 %1649  ;;  %v1698_v13 = vmul.f32 %v2668_v10, %v3331_v63  ;;  %v1713_v23 = vmax.f32 %v1697_v7, 0.0 }
 0x7f2   :  { %2673 = vrsqrt.f32 %v1676_v3  ;;  %v1673_v30 = vmax.f32 %v1650_v11, 1e-24  ;;  %v1730_v29 = vpack.c.bf16 %v1716_v21, %v1715_v61 }
 0x7f3   :  { %v2670_v12 = vpop.eup %2669  ;;  %2675 = vrsqrt.f32 %v1675_v62  ;;  %v1652_v15 = vpop.xlane.xlu1 %1651  ;;  %v1714_v14 = vmax.f32 %v1698_v13, 0.0 }
 0x7f4   :  { %2677 = vrsqrt.f32 %v1673_v30  ;;  %v1674_v24 = vmax.f32 %v1652_v15, 1e-24  ;;  %v1701_v58 = vmul.f32 %v2670_v12, %v3340_v42 }
 0x7f5   :  { %v2672_v22 = vpop.eup %2671  ;;  %v1662_v28 = vpop.xlane.xlu0 %1661  ;;  %v1729_v53 = vpack.c.bf16 %v1714_v14, %v1713_v23 }
 0x7f6   :  { %2679 = vrsqrt.f32 %v1674_v24  ;;  %v1702_v63 = vmul.f32 %v2672_v22, %v3343_v41  ;;  %v1679_v54 = vmax.f32 %v1662_v28, 1e-24  ;;  %v1717_v48 = vmax.f32 %v1701_v58, 0.0 }
 0x7f7   :  { %v1664_v8 = vpop.xlane.xlu1 %1663  ;;  %2458 = vmatprep.mubr.bf16.mxu0 %v1729_v53 }
 0x7f8   :  { %v1680_v34 = vmax.f32 %v1664_v8, 1e-24  ;;  %2459 = vmatmul.mubr.bf16.vlgmr.msra.gmra.mrb[32].mxu0 %v1730_v29  ;;  %v1718_v49 = vmax.f32 %v1702_v63, 0.0 }
 0x7f9   :  { %v1658_v26 = vpop.xlane.xlu0 %1657 }
 0x7fa   :  { %2681 = vrsqrt.f32 %v1680_v34  ;;  %v1677_v1 = vmax.f32 %v1658_v26, 1e-24  ;;  %v1731_v51 = vpack.c.bf16 %v1718_v49, %v1717_v48 }
 0x7fb   :  { %2683 = vrsqrt.f32 %v1679_v54  ;;  %v1660_v42 = vpop.xlane.xlu1 %1659 }
 0x7fc   :  { %v2674_v36 = vpop.eup %2673  ;;  %2685 = vrsqrt.f32 %v1677_v1  ;;  %v1678_v55 = vmax.f32 %v1660_v42, 1e-24  ;;  %2462 = vmatprep.mubr.bf16.mxu0 %v1731_v51 }
 0x7fd   :  { %v2676_v44 = vpop.eup %2675  ;;  %v1646_v56 = vpop.xlane.xlu0 %1645  ;;  %v1708_v0 = vmul.f32 %v2674_v36, %v3356_v9 }
 0x7fe   :  { %v2678_v41 = vpop.eup %2677  ;;  %2687 = vrsqrt.f32 %v1678_v55  ;;  %v1671_v2 = vmax.f32 %v1646_v56, 1e-24  ;;  %v1707_v50 = vmul.f32 %v2676_v44, %v3350_v60 }
 0x7ff   :  { %v1648_v59 = vpop.xlane.xlu1 %1647  ;;  %v1705_v4 = vmul.f32 %v2678_v41, %v3353_v46  ;;  %v1724_v5 = vmax.f32 %v1708_v0, 0.0 }
 0x800   :  { %v2680_v6 = vpop.eup %2679  ;;  %2689 = vrsqrt.f32 %v1671_v2  ;;  %v1672_v47 = vmax.f32 %v1648_v59, 1e-24  ;;  %v1723_v7 = vmax.f32 %v1707_v50, 0.0 }
 0x801   :  { %v1706_v43 = vmul.f32 %v2680_v6, %v3361_v57  ;;  %v1721_v45 = vmax.f32 %v1705_v4, 0.0 }
 0x802   :  { %2691 = vrsqrt.f32 %v1672_v47  ;;  %v1734_v3 = vpack.c.bf16 %v1724_v5, %v1723_v7 }
 0x803   :  { %v1722_v62 = vmax.f32 %v1706_v43, 0.0 }
 0x804   :  { %v2682_v35 = vpop.eup %2681 }
 0x805   :  { %v2684_v10 = vpop.eup %2683  ;;  %v1733_v9 = vpack.c.bf16 %v1722_v62, %v1721_v45  ;;  %v1712_v11 = vmul.f32 %v2682_v35, %v3376_v18 }
 0x806   :  { %v2686_v37 = vpop.eup %2685  ;;  %v1711_v13 = vmul.f32 %v2684_v10, %v3368_v27  ;;  %v2041_v27 = vld [vmem:[%s3445_s7] ss:$0 sm:$0xff]  ;;  %s2873_s7 = smov [#allocation13]  }
 0x807   :  { %2466 = vmatprep.mubr.bf16.mxu1 %v1733_v9  ;;  %v1709_v46 = vmul.f32 %v2686_v37, %v3373_v16  ;;  %v1728_v30 = vmax.f32 %v1712_v11, 0.0  ;;  %s1959_s14 = sshll.u32 %s2873_s7, 4  ;;  %s1960_s14 = int_to_ptr.vmem [resolvable:$true] %s1959_s14 }
 0x808   :  { %v2688_v60 = vpop.eup %2687  ;;  %2467 = vmatmul.mubr.bf16.vlgmr.msra.gmra.mrb[64].mxu1 %v1734_v3  ;;  %v1727_v61 = vmax.f32 %v1711_v13, 0.0  ;;  %s2833_s15 = scalar_lea.vmem %s1960_s14, 2048  ;;  %p2838_p7 = scmp.lt.s32.totalorder %s1960_s14, %s1960_s14 }
 0x809   :  { %v1710_v57 = vmul.f32 %v2688_v60, %v3381_v25  ;;  %v1725_v12 = vmax.f32 %v1709_v46, 0.0  ;;  %p2834_p6 = scmp.ne.s32.totalorder %s1960_s14, %s2833_s15  ;;  %p2839_p8 = scmp.lt.s32.totalorder %s2833_s15, %s2833_s15 }
 0x80a   :  { %v2690_v21 = vpop.eup %2689  ;;  %v1736_v58 = vpack.c.bf16 %v1728_v30, %v1727_v61 }
 0x80b   :  { %v1726_v15 = vmax.f32 %v1710_v57, 0.0  ;;  %v1703_v23 = vmul.f32 %v2690_v21, %v3386_v20  ;;  %p2840_p9 = por %p2839_p8, %p2838_p7 }
 0x80c   :  { %v2692_v14 = vpop.eup %2691 }
 0x80d   :  { %v1735_v24 = vpack.c.bf16 %v1726_v15, %v1725_v12  ;;  %v1704_v18 = vmul.f32 %v2692_v14, %v3391_v32  ;;  %v1719_v16 = vmax.f32 %v1703_v23, 0.0  ;;  %p2841_p10 = pnand %p2840_p9, %p2834_p6 }
 0x80f   :  { %2470 = vmatprep.mubr.bf16.mxu1 %v1735_v24  ;;  %v1720_v22 = vmax.f32 %v1704_v18, 0.0 }
 0x810   :  { %2471 = vmatmul.mubr.bf16.gmra.mrb[68].mxu1 %v1736_v58 }
 0x811   :  { %v1732_v28 = vpack.c.bf16 %v1720_v22, %v1719_v16 }
 0x813   :  { %2463 = vmatmul.mubr.bf16.gmra.mrb[36].mxu0 %v1732_v28 }
 0x8cb   :  { %v2460_v25 = vpop.f32.mrb[32].mxu0 }
 0x8cc   :  { %v1924_v53 = vadd.f32 %v2460_v25, %v2041_v27  ;;  %v1836_v29 = vpop.f32.mrb[33].mxu0 }
 0x8cd   :  { %v1922_v20 = vadd.f32 %v2041_v27, %v1836_v29  ;;  %v2461_v63 = vpop.f32.mrb[34].mxu0 }
 0x8ce   :  { %1940 = vst [vmem:[#allocation13 + $0x10] sm:$0xff] %v1924_v53  ;;  %v1925_v54 = vadd.f32 %v2461_v63, %v2041_v27  ;;  %v1839_v8 = vpop.f32.mrb[35].mxu0 }
 0x8cf   :  { %1938 = vst [vmem:[#allocation13] sm:$0xff] %v1922_v20  ;;  %v1923_v32 = vadd.f32 %v2041_v27, %v1839_v8 }
 0x8d0   :  { %1941 = vst [vmem:[#allocation13 + $0x18] sm:$0xff] %v1925_v54 }
 0x8d1   :  { %1939 = vst [vmem:[#allocation13 + $0x8] sm:$0xff] %v1923_v32 }
 0x8db   :  { %v2468_v34 = vpop.f32.mrb[64].mxu1 }
 0x8dc   :  { %v2490_v48 = vadd.f32 %v2468_v34, %v3298_v33  ;;  %v1868_v49 = vpop.f32.mrb[65].mxu1 }
 0x8dd   :  { %v2491_v26 = vadd.f32 %v1868_v49, %v3300_v19  ;;  %v2469_v1 = vpop.f32.mrb[66].mxu1 }
 0x8de   :  { %v1932_v51 = vadd.f32 %v2490_v48, %v2041_v27  ;;  %v2492_v42 = vadd.f32 %v2469_v1, %v3302_v52  ;;  %v1871_v36 = vpop.f32.mrb[67].mxu1 }
 0x8df   :  { %v1930_v55 = vadd.f32 %v2491_v26, %v2041_v27  ;;  %v2493_v44 = vadd.f32 %v1871_v36, %v3304_v31 }
 0x8e0   :  { %1948 = vst [vmem:[#allocation13 + $0x50] sm:$0xff] %v1932_v51  ;;  %v1933_v56 = vadd.f32 %v2492_v42, %v2041_v27 }
 0x8e1   :  { %1946 = vst [vmem:[#allocation13 + $0x40] sm:$0xff] %v1930_v55  ;;  %v1931_v41 = vadd.f32 %v2493_v44, %v2041_v27 }
 0x8e2   :  { %1949 = vst [vmem:[#allocation13 + $0x58] sm:$0xff] %v1933_v56 }
 0x8e3   :  { %1947 = vst [vmem:[#allocation13 + $0x48] sm:$0xff] %v1931_v41  ;;  %v2472_v0 = vpop.f32.mrb[68].mxu1 }
 0x8e4   :  { %v2494_v33 = vadd.f32 %v2472_v0, %v3306_v17  ;;  %v1884_v2 = vpop.f32.mrb[69].mxu1 }
 0x8e5   :  { %v2495_v19 = vadd.f32 %v1884_v2, %v3308_v38  ;;  %v2473_v59 = vpop.f32.mrb[70].mxu1 }
 0x8e6   :  { %v1936_v4 = vadd.f32 %v2494_v33, %v2041_v27  ;;  %v2496_v52 = vadd.f32 %v2473_v59, %v3310_v39  ;;  %v2464_v6 = vpop.f32.mrb[36].mxu0  ;;  %v1887_v50 = vpop.f32.mrb[71].mxu1 }
 0x8e7   :  { %v1934_v31 = vadd.f32 %v2495_v19, %v2041_v27  ;;  %v1928_v47 = vadd.f32 %v2464_v6, %v2041_v27  ;;  %v2497_v43 = vadd.f32 %v1887_v50, %v3312_v40  ;;  %v1852_v5 = vpop.f32.mrb[37].mxu0 }
 0x8e8   :  { %1952 = vst [vmem:[#allocation13 + $0x70] sm:$0xff] %v1936_v4  ;;  %v1937_v45 = vadd.f32 %v2496_v52, %v2041_v27  ;;  %v1926_v62 = vadd.f32 %v2041_v27, %v1852_v5  ;;  %v2465_v17 = vpop.f32.mrb[38].mxu0 }
 0x8e9   :  { %1950 = vst [vmem:[#allocation13 + $0x60] sm:$0xff] %v1934_v31  ;;  %1944 = vst [vmem:[#allocation13 + $0x30] sm:$0xff] %v1928_v47  ;;  %v1935_v38 = vadd.f32 %v2497_v43, %v2041_v27  ;;  %v1929_v35 = vadd.f32 %v2465_v17, %v2041_v27  ;;  %v1855_v7 = vpop.f32.mrb[39].mxu0 }
 0x8ea   :  { %1953 = vst [vmem:[#allocation13 + $0x78] sm:$0xff] %v1937_v45  ;;  %1942 = vst [vmem:[#allocation13 + $0x20] sm:$0xff] %v1926_v62  ;;  %v1927_v39 = vadd.f32 %v2041_v27, %v1855_v7 }
 0x8eb   :  { %1951 = vst [vmem:[#allocation13 + $0x68] sm:$0xff] %v1935_v38  ;;  %1945 = vst [vmem:[#allocation13 + $0x38] sm:$0xff] %v1929_v35 }
 0x8ec   :  { %1943 = vst [vmem:[#allocation13 + $0x28] sm:$0xff] %v1927_v39 }
 0x8ed   :  { %2844 = shalt.err (!%p2841_p10)
}
 0x8ee   :  { %s2845_s20 = scalar_lea.hbm %s3446_s8, 2048 }
 0x8ef   :  { %p2846_p11 = scmp.ne.s32.totalorder %s3446_s8, %s2845_s20  ;;  %p2849_p12 = scmp.lt.u32.totalorder %s2845_s20, %s3446_s8 }
 0x8f1   :  { %p2851_p13 = pnand %p2849_p12, %p2846_p11 }
 0x8f3   :  { %2854 = shalt.err (!%p2851_p13)
}
 0x8f4   :  { %s2874_s12 = smov 128   ;;  %s2875_s22 = smov 8  }
 0x8f5   :  { %1965 = dma.vmem_to_hbm [thread:$0]  %s1960_s14, 2048, %s3446_s8, [#allocation4], %s2874_s12, %s2874_s12, %s2875_s22  }
 0x8f6   :  { %2863 = dma.done.wait [#allocation4], 2048  }
 0x8f7   :  { %2864 = vsyncadd [#allocation4], 4294965248 }
 0x8f8   :  { %1969 = vsyncpa [#allocation3], 1 }
 0x8f9   :  { %1970 = vsyncpa [#allocation6], 1 }
 0x8fa   :  { %1971 = vsyncpa [#allocation9], 1 }
 0x8fb   :  { %1972 = vsyncpa [#allocation12], 1 }
 0x8fc   :  { %1973 = vsyncpa [#allocation4], 1 }

</bundles_post_ra>
